<compile_context>
chip_gen: v5e
topology: v5e:2x2
jax: 0.10.0
libtpu: 0.0.40
codegen_flags: <defaults>
</compile_context>

<pallas_src>
import functools

import jax
import jax.numpy as jnp
from jax import lax
from jax.experimental import pallas as pl
from jax.experimental.pallas import tpu as pltpu

_EPS = 1e-5  # nn.InstanceNorm2d default


def _convblock_kernel(x_ref, w1_ref, b1_ref, w2_ref, b2_ref, o_ref, mid_ref,
                      *, h, w, wp, eps):
    """One batch element per grid step. Channel-major, spatially flat layout.

    x_ref:   (1, Cin,  L)    zero-padded flattened input, L = (H+3)*(W+2)
    w1_ref:  (9, Cout, Cin)  conv1 per-tap matrices (tap t = dy*3+dx), bf16
    b1_ref:  (Cout, 1)       conv1 bias, f32
    w2_ref:  (9, Cout, Cout) conv2 per-tap matrices, bf16
    b2_ref:  (Cout, 1)       conv2 bias, f32
    o_ref:   (1, Cout, H*Wp) "wide" output plane; columns W, W+1 of each row are
                             wrap-around filler that the wrapper slices off
    mid_ref: (Cout, L)       VMEM scratch: zero-padded flattened stage-1
                             activation (its halo provides conv2's zero padding)
    """
    hwp = h * wp                       # wide plane length
    cout = o_ref.shape[1]
    l = mid_ref.shape[1]

    # ----- hoisted loop-invariant loads ------------------------------------
    x = x_ref[0]                       # (Cin, L)        bf16
    w1 = w1_ref[...]                   # (9, Cout, Cin)  bf16
    w2 = w2_ref[...]                   # (9, Cout, Cout) bf16
    b1 = b1_ref[...]                   # (Cout, 1)       f32
    b2 = b2_ref[...]                   # (Cout, 1)       f32

    # Lane p = i*Wp + j is a real output pixel iff j < W; j in {W, W+1} are
    # wrap-around columns of the flat-shift trick. Multiplicative f32 mask.
    lane = lax.broadcasted_iota(jnp.int32, (1, hwp), 1)
    maskf = ((lane % wp) < w).astype(jnp.float32)      # (1, H*Wp)
    inv_cnt = 1.0 / float(h * w)

    def conv9(src, taps, bias):
        # 3x3 conv as 9 whole-plane MXU matmuls over contiguous flat shifts:
        #   out[:, i*Wp + j] += taps[dy*3+dx] @ src[:, (i+dy)*Wp + (j+dx)]
        acc = jnp.zeros((cout, hwp), jnp.float32)
        for dy in range(3):
            for dx in range(3):
                off = dy * wp + dx
                acc += jnp.dot(taps[dy * 3 + dx], src[:, off:off + hwp],
                               preferred_element_type=jnp.float32)
        return acc + bias

    def inorm_relu(acc):
        # Per-channel biased mean/var over the H*W valid pixels (masked), fused
        # on the in-register accumulator; normalize + ReLU; zero wrap columns.
        s = jnp.sum(acc * maskf, axis=1, keepdims=True)
        mu = s * inv_cnt
        d = acc - mu
        var = jnp.sum((d * d) * maskf, axis=1, keepdims=True) * inv_cnt
        z = jnp.maximum(d * lax.rsqrt(var + eps), 0.0)
        return z * maskf

    # Keep the never-written halo regions of the scratch zeroed: the top padded
    # row + first left-halo pixel ([0, Wp+1)) and everything past the last
    # interior pixel ([Wp+1+H*Wp, L)). Cheap (~54 lanes) and done every step so
    # it stays correct even if the batch axis is split across TensorCores.
    mid_ref[:, :wp + 1] = jnp.zeros((cout, wp + 1), jnp.float32)
    mid_ref[:, wp + 1 + hwp:] = jnp.zeros((cout, l - (wp + 1 + hwp)), jnp.float32)

    # ---- stage 1: conv1 -> InstanceNorm -> ReLU (Dropout2d == id in eval) --
    y1 = inorm_relu(conv9(x, w1, b1))                   # (Cout, H*Wp) f32
    # Interior scatter in one contiguous store: valid pixel (i, j) lands at
    # flat (i+1)*Wp + (j+1) = p + Wp + 1; the zeroed wrap columns land exactly
    # on the left/right halo columns, keeping conv2's zero padding intact.
    mid_ref[:, wp + 1:wp + 1 + hwp] = y1

    # ---- stage 2: conv2 -> InstanceNorm -> ReLU ----------------------------
    m = mid_ref[...].astype(jnp.bfloat16)               # (Cout, L)
    o_ref[0] = inorm_relu(conv9(m, w2, b2))


def conv_block_forward(x, w1, b1, w2, b2, *, eps=_EPS):
    """ConvBlock forward (eval mode).

    Args:
      x:  (N, Cin, H, W) input, PyTorch NCHW layout.
      w1: (Cout, Cin, 3, 3), b1: (Cout,)  -- first conv, PyTorch OIHW layout.
      w2: (Cout, Cout, 3, 3), b2: (Cout,) -- second conv.
    Returns:
      (N, Cout, H, W) float32.
    """
    n, cin, h, w = x.shape
    cout = w1.shape[0]
    assert w1.shape == (cout, cin, 3, 3), w1.shape
    assert w2.shape == (cout, cout, 3, 3), w2.shape
    assert b1.shape == (cout,) and b2.shape == (cout,)

    wp = w + 2
    hwp = h * wp                 # "wide" flat output plane per sample/channel
    l = (h + 3) * wp             # padded flat length; the extra zero row keeps
                                 # the last tap's shifted slice in bounds

    # Channel-major, spatially flattened + zero-padded input. No NCHW<->NHWC
    # transposes; pixels sit on lanes (lane-dense). bf16 operands feed the
    # native MXU path (accumulation stays f32 inside the kernel).
    xf = jnp.pad(x.astype(jnp.bfloat16),
                 ((0, 0), (0, 0), (1, 2), (1, 1))).reshape(n, cin, l)
    # Per-tap (Cout, Cin) matrices, tap index t = dy*3 + dx.
    w1t = jnp.transpose(w1, (2, 3, 0, 1)).reshape(9, cout, cin).astype(jnp.bfloat16)
    w2t = jnp.transpose(w2, (2, 3, 0, 1)).reshape(9, cout, cout).astype(jnp.bfloat16)
    b1c = b1.reshape(cout, 1).astype(jnp.float32)
    b2c = b2.reshape(cout, 1).astype(jnp.float32)

    kernel = functools.partial(_convblock_kernel, h=h, w=w, wp=wp, eps=eps)
    out_wide = pl.pallas_call(
        kernel,
        out_shape=jax.ShapeDtypeStruct((n, cout, hwp), jnp.float32),
        grid=(n,),
        in_specs=[
            pl.BlockSpec((1, cin, l), lambda b: (b, 0, 0)),
            pl.BlockSpec((9, cout, cin), lambda b: (0, 0, 0)),
            pl.BlockSpec((cout, 1), lambda b: (0, 0)),
            pl.BlockSpec((9, cout, cout), lambda b: (0, 0, 0)),
            pl.BlockSpec((cout, 1), lambda b: (0, 0)),
        ],
        out_specs=pl.BlockSpec((1, cout, hwp), lambda b: (b, 0, 0)),
        scratch_shapes=[pltpu.VMEM((cout, l), jnp.float32)],
        compiler_params=pltpu.CompilerParams(
            dimension_semantics=("parallel",)),
    )(xf, w1t, b1c, w2t, b2c)

    # Drop the two wrap-around columns of each wide row -> NCHW output.
    return out_wide.reshape(n, cout, h, wp)[:, :, :, :w]


def _ref_conv_block(x, w1, b1, w2, b2, eps=_EPS):
    """Pure-JAX reference (matches PyTorch ConvBlock in eval mode, full f32)."""
    def stage(y, wt, bias):
        y = lax.conv_general_dilated(
            y, wt, window_strides=(1, 1), padding="SAME",
            dimension_numbers=("NCHW", "OIHW", "NCHW"),
            precision=lax.Precision.HIGHEST)
        y = y + bias[None, :, None, None]
        mu = jnp.mean(y, axis=(2, 3), keepdims=True)
        var = jnp.var(y, axis=(2, 3), keepdims=True)   # biased, like PyTorch
        return jnp.maximum((y - mu) / jnp.sqrt(var + eps), 0.0)

    return stage(stage(x, w1, b1), w2, b2)


if __name__ == "__main__":
    key = jax.random.PRNGKey(0)
    k_x, k_w1, k_b1, k_w2, k_b2 = jax.random.split(key, 5)

    # Small shapes consistent with the module: NCHW input, two 3x3 convs.
    N, CIN, COUT, H, W = 2, 4, 8, 16, 16
    x = jax.random.normal(k_x, (N, CIN, H, W), dtype=jnp.float32)
    w1 = 0.1 * jax.random.normal(k_w1, (COUT, CIN, 3, 3), dtype=jnp.float32)
    b1 = 0.1 * jax.random.normal(k_b1, (COUT,), dtype=jnp.float32)
    w2 = 0.1 * jax.random.normal(k_w2, (COUT, COUT, 3, 3), dtype=jnp.float32)
    b2 = 0.1 * jax.random.normal(k_b2, (COUT,), dtype=jnp.float32)

    out = conv_block_forward(x, w1, b1, w2, b2)
    out = jax.block_until_ready(out)

    ref = _ref_conv_block(x, w1, b1, w2, b2)
    assert out.shape == (N, COUT, H, W), out.shape
    assert out.dtype == jnp.float32, out.dtype
    max_err = float(jnp.max(jnp.abs(out - ref)))
    # Kernel uses bf16 MXU operands (f32 accumulation) vs. an all-f32 HIGHEST
    # reference, so allow bf16-level operand-rounding error.
    assert jnp.allclose(out, ref, atol=2e-2, rtol=2e-2), max_err

    print("KERNEL_OK")
</pallas_src>

<mosaic_0001>
module attributes {stable_mosaic.version = 11 : i64} {
  func.func @_convblock_kernel(%arg0: i32, %arg1: memref<1x4x342xbf16, #tpu.memory_space<vmem>>, %arg2: memref<9x8x4xbf16, #tpu.memory_space<vmem>>, %arg3: memref<8x1xf32, #tpu.memory_space<vmem>>, %arg4: memref<9x8x8xbf16, #tpu.memory_space<vmem>>, %arg5: memref<8x1xf32, #tpu.memory_space<vmem>>, %arg6: memref<1x8x288xf32, #tpu.memory_space<vmem>>, %arg7: memref<8x342xf32, #tpu.memory_space<vmem>>) attributes {dimension_semantics = [#tpu.dimension_semantics<parallel>], iteration_bounds = array<i64: 2>, scalar_prefetch = 0 : i64, scratch_operands = 1 : i64, tpu.core_type = #tpu.core_type<tc>, window_params = [{transform_indices = @transform_0, window_bounds = array<i64: 1, 4, 342>}, {pipeline_mode = #tpu.pipeline_mode<synchronous>, transform_indices = @transform_1, window_bounds = array<i64: 9, 8, 4>}, {pipeline_mode = #tpu.pipeline_mode<synchronous>, transform_indices = @transform_2, window_bounds = array<i64: 8, 1>}, {pipeline_mode = #tpu.pipeline_mode<synchronous>, transform_indices = @transform_3, window_bounds = array<i64: 9, 8, 8>}, {pipeline_mode = #tpu.pipeline_mode<synchronous>, transform_indices = @transform_4, window_bounds = array<i64: 8, 1>}, {transform_indices = @transform_5, window_bounds = array<i64: 1, 8, 288>}]} {
    %c0 = arith.constant 0 : index
    %c0_0 = arith.constant 0 : index
    %c0_1 = arith.constant 0 : index
    %0 = vector.load %arg1[%c0, %c0_0, %c0_1] : memref<1x4x342xbf16, #tpu.memory_space<vmem>>, vector<1x4x342xbf16>
    %1 = vector.shape_cast %0 : vector<1x4x342xbf16> to vector<4x342xbf16>
    %c0_2 = arith.constant 0 : index
    %c0_3 = arith.constant 0 : index
    %c0_4 = arith.constant 0 : index
    %2 = vector.load %arg2[%c0_2, %c0_3, %c0_4] : memref<9x8x4xbf16, #tpu.memory_space<vmem>>, vector<9x8x4xbf16>
    %c0_5 = arith.constant 0 : index
    %c0_6 = arith.constant 0 : index
    %c0_7 = arith.constant 0 : index
    %3 = vector.load %arg4[%c0_5, %c0_6, %c0_7] : memref<9x8x8xbf16, #tpu.memory_space<vmem>>, vector<9x8x8xbf16>
    %c0_8 = arith.constant 0 : index
    %c0_9 = arith.constant 0 : index
    %4 = vector.load %arg3[%c0_8, %c0_9] : memref<8x1xf32, #tpu.memory_space<vmem>>, vector<8x1xf32>
    %c0_10 = arith.constant 0 : index
    %c0_11 = arith.constant 0 : index
    %5 = vector.load %arg5[%c0_10, %c0_11] : memref<8x1xf32, #tpu.memory_space<vmem>>, vector<8x1xf32>
    %6 = tpu.iota {dimensions = array<i32: 1>} : vector<1x288xi32>
    %c18_i32 = arith.constant 18 : i32
    %c0_i32 = arith.constant 0 : i32
    %7 = arith.cmpi eq, %c18_i32, %c0_i32 : i32
    %c1_i32 = arith.constant 1 : i32
    %8 = arith.select %7, %c1_i32, %c18_i32 : i32
    %9 = vector.broadcast %8 : i32 to vector<1x288xi32>
    %10 = arith.remsi %6, %9 : vector<1x288xi32>
    %c0_i32_12 = arith.constant 0 : i32
    %11 = vector.broadcast %c0_i32_12 : i32 to vector<1x288xi32>
    %12 = arith.cmpi ne, %10, %11 : vector<1x288xi32>
    %c0_i32_13 = arith.constant 0 : i32
    %13 = vector.broadcast %c0_i32_13 : i32 to vector<1x288xi32>
    %14 = arith.cmpi slt, %10, %13 : vector<1x288xi32>
    %c0_i32_14 = arith.constant 0 : i32
    %15 = arith.cmpi slt, %8, %c0_i32_14 : i32
    %16 = vector.broadcast %15 : i1 to vector<1x288xi1>
    %17 = vector.broadcast %16 : vector<1x288xi1> to vector<1x288xi1>
    %18 = arith.xori %14, %17 : vector<1x288xi1>
    %19 = arith.andi %18, %12 : vector<1x288xi1>
    %20 = vector.broadcast %8 : i32 to vector<1x288xi32>
    %21 = arith.addi %10, %20 : vector<1x288xi32>
    %22 = arith.select %19, %21, %10 : vector<1x288xi1>, vector<1x288xi32>
    %c16_i32 = arith.constant 16 : i32
    %23 = vector.broadcast %c16_i32 : i32 to vector<1x288xi32>
    %24 = arith.cmpi slt, %22, %23 : vector<1x288xi32>
    %25 = arith.extui %24 : vector<1x288xi1> to vector<1x288xi32>
    %26 = arith.sitofp %25 : vector<1x288xi32> to vector<1x288xf32>
    %cst = arith.constant 0.000000e+00 : f32
    %27 = vector.broadcast %cst : f32 to vector<8x19xf32>
    %c0_15 = arith.constant 0 : index
    %c0_16 = arith.constant 0 : index
    %28 = vector.load %arg7[%c0_15, %c0_16] : memref<8x342xf32, #tpu.memory_space<vmem>>, vector<8x19xf32>
    tpu.vector_store %arg7[%c0_15, %c0_16], %27 {strides = array<i32>} : memref<8x342xf32, #tpu.memory_space<vmem>>, vector<8x19xf32>,
    %cst_17 = arith.constant 0.000000e+00 : f32
    %29 = vector.broadcast %cst_17 : f32 to vector<8x35xf32>
    %c0_18 = arith.constant 0 : index
    %c307 = arith.constant 307 : index
    %30 = vector.load %arg7[%c0_18, %c307] : memref<8x342xf32, #tpu.memory_space<vmem>>, vector<8x35xf32>
    tpu.vector_store %arg7[%c0_18, %c307], %29 {strides = array<i32>} : memref<8x342xf32, #tpu.memory_space<vmem>>, vector<8x35xf32>,
    %cst_19 = arith.constant 0.000000e+00 : f32
    %31 = vector.broadcast %cst_19 : f32 to vector<8x288xf32>
    %32 = vector.extract_strided_slice %2 {offsets = [0, 0, 0], sizes = [1, 8, 4], strides = [1, 1, 1]} : vector<9x8x4xbf16> to vector<1x8x4xbf16>
    %33 = vector.shape_cast %32 : vector<1x8x4xbf16> to vector<8x4xbf16>
    %34 = vector.extract_strided_slice %1 {offsets = [0, 0], sizes = [4, 288], strides = [1, 1]} : vector<4x342xbf16> to vector<4x288xbf16>
    %cst_20 = arith.constant dense<0.000000e+00> : vector<8x288xf32>
    %35 = tpu.matmul %33, %34, %cst_20 {dimension_numbers = #tpu.dot_dimension_numbers<[1], [0], [0], [1], [0, 0, 1, 1], [], []>} : vector<8x4xbf16>, vector<4x288xbf16>, vector<8x288xf32> -> vector<8x288xf32>
    %36 = arith.addf %31, %35 : vector<8x288xf32>
    %37 = vector.extract_strided_slice %2 {offsets = [1, 0, 0], sizes = [1, 8, 4], strides = [1, 1, 1]} : vector<9x8x4xbf16> to vector<1x8x4xbf16>
    %38 = vector.shape_cast %37 : vector<1x8x4xbf16> to vector<8x4xbf16>
    %39 = vector.extract_strided_slice %1 {offsets = [0, 1], sizes = [4, 288], strides = [1, 1]} : vector<4x342xbf16> to vector<4x288xbf16>
    %cst_21 = arith.constant dense<0.000000e+00> : vector<8x288xf32>
    %40 = tpu.matmul %38, %39, %cst_21 {dimension_numbers = #tpu.dot_dimension_numbers<[1], [0], [0], [1], [0, 0, 1, 1], [], []>} : vector<8x4xbf16>, vector<4x288xbf16>, vector<8x288xf32> -> vector<8x288xf32>
    %41 = arith.addf %36, %40 : vector<8x288xf32>
    %42 = vector.extract_strided_slice %2 {offsets = [2, 0, 0], sizes = [1, 8, 4], strides = [1, 1, 1]} : vector<9x8x4xbf16> to vector<1x8x4xbf16>
    %43 = vector.shape_cast %42 : vector<1x8x4xbf16> to vector<8x4xbf16>
    %44 = vector.extract_strided_slice %1 {offsets = [0, 2], sizes = [4, 288], strides = [1, 1]} : vector<4x342xbf16> to vector<4x288xbf16>
    %cst_22 = arith.constant dense<0.000000e+00> : vector<8x288xf32>
    %45 = tpu.matmul %43, %44, %cst_22 {dimension_numbers = #tpu.dot_dimension_numbers<[1], [0], [0], [1], [0, 0, 1, 1], [], []>} : vector<8x4xbf16>, vector<4x288xbf16>, vector<8x288xf32> -> vector<8x288xf32>
    %46 = arith.addf %41, %45 : vector<8x288xf32>
    %47 = vector.extract_strided_slice %2 {offsets = [3, 0, 0], sizes = [1, 8, 4], strides = [1, 1, 1]} : vector<9x8x4xbf16> to vector<1x8x4xbf16>
    %48 = vector.shape_cast %47 : vector<1x8x4xbf16> to vector<8x4xbf16>
    %49 = vector.extract_strided_slice %1 {offsets = [0, 18], sizes = [4, 288], strides = [1, 1]} : vector<4x342xbf16> to vector<4x288xbf16>
    %cst_23 = arith.constant dense<0.000000e+00> : vector<8x288xf32>
    %50 = tpu.matmul %48, %49, %cst_23 {dimension_numbers = #tpu.dot_dimension_numbers<[1], [0], [0], [1], [0, 0, 1, 1], [], []>} : vector<8x4xbf16>, vector<4x288xbf16>, vector<8x288xf32> -> vector<8x288xf32>
    %51 = arith.addf %46, %50 : vector<8x288xf32>
    %52 = vector.extract_strided_slice %2 {offsets = [4, 0, 0], sizes = [1, 8, 4], strides = [1, 1, 1]} : vector<9x8x4xbf16> to vector<1x8x4xbf16>
    %53 = vector.shape_cast %52 : vector<1x8x4xbf16> to vector<8x4xbf16>
    %54 = vector.extract_strided_slice %1 {offsets = [0, 19], sizes = [4, 288], strides = [1, 1]} : vector<4x342xbf16> to vector<4x288xbf16>
    %cst_24 = arith.constant dense<0.000000e+00> : vector<8x288xf32>
    %55 = tpu.matmul %53, %54, %cst_24 {dimension_numbers = #tpu.dot_dimension_numbers<[1], [0], [0], [1], [0, 0, 1, 1], [], []>} : vector<8x4xbf16>, vector<4x288xbf16>, vector<8x288xf32> -> vector<8x288xf32>
    %56 = arith.addf %51, %55 : vector<8x288xf32>
    %57 = vector.extract_strided_slice %2 {offsets = [5, 0, 0], sizes = [1, 8, 4], strides = [1, 1, 1]} : vector<9x8x4xbf16> to vector<1x8x4xbf16>
    %58 = vector.shape_cast %57 : vector<1x8x4xbf16> to vector<8x4xbf16>
    %59 = vector.extract_strided_slice %1 {offsets = [0, 20], sizes = [4, 288], strides = [1, 1]} : vector<4x342xbf16> to vector<4x288xbf16>
    %cst_25 = arith.constant dense<0.000000e+00> : vector<8x288xf32>
    %60 = tpu.matmul %58, %59, %cst_25 {dimension_numbers = #tpu.dot_dimension_numbers<[1], [0], [0], [1], [0, 0, 1, 1], [], []>} : vector<8x4xbf16>, vector<4x288xbf16>, vector<8x288xf32> -> vector<8x288xf32>
    %61 = arith.addf %56, %60 : vector<8x288xf32>
    %62 = vector.extract_strided_slice %2 {offsets = [6, 0, 0], sizes = [1, 8, 4], strides = [1, 1, 1]} : vector<9x8x4xbf16> to vector<1x8x4xbf16>
    %63 = vector.shape_cast %62 : vector<1x8x4xbf16> to vector<8x4xbf16>
    %64 = vector.extract_strided_slice %1 {offsets = [0, 36], sizes = [4, 288], strides = [1, 1]} : vector<4x342xbf16> to vector<4x288xbf16>
    %cst_26 = arith.constant dense<0.000000e+00> : vector<8x288xf32>
    %65 = tpu.matmul %63, %64, %cst_26 {dimension_numbers = #tpu.dot_dimension_numbers<[1], [0], [0], [1], [0, 0, 1, 1], [], []>} : vector<8x4xbf16>, vector<4x288xbf16>, vector<8x288xf32> -> vector<8x288xf32>
    %66 = arith.addf %61, %65 : vector<8x288xf32>
    %67 = vector.extract_strided_slice %2 {offsets = [7, 0, 0], sizes = [1, 8, 4], strides = [1, 1, 1]} : vector<9x8x4xbf16> to vector<1x8x4xbf16>
    %68 = vector.shape_cast %67 : vector<1x8x4xbf16> to vector<8x4xbf16>
    %69 = vector.extract_strided_slice %1 {offsets = [0, 37], sizes = [4, 288], strides = [1, 1]} : vector<4x342xbf16> to vector<4x288xbf16>
    %cst_27 = arith.constant dense<0.000000e+00> : vector<8x288xf32>
    %70 = tpu.matmul %68, %69, %cst_27 {dimension_numbers = #tpu.dot_dimension_numbers<[1], [0], [0], [1], [0, 0, 1, 1], [], []>} : vector<8x4xbf16>, vector<4x288xbf16>, vector<8x288xf32> -> vector<8x288xf32>
    %71 = arith.addf %66, %70 : vector<8x288xf32>
    %72 = vector.extract_strided_slice %2 {offsets = [8, 0, 0], sizes = [1, 8, 4], strides = [1, 1, 1]} : vector<9x8x4xbf16> to vector<1x8x4xbf16>
    %73 = vector.shape_cast %72 : vector<1x8x4xbf16> to vector<8x4xbf16>
    %74 = vector.extract_strided_slice %1 {offsets = [0, 38], sizes = [4, 288], strides = [1, 1]} : vector<4x342xbf16> to vector<4x288xbf16>
    %cst_28 = arith.constant dense<0.000000e+00> : vector<8x288xf32>
    %75 = tpu.matmul %73, %74, %cst_28 {dimension_numbers = #tpu.dot_dimension_numbers<[1], [0], [0], [1], [0, 0, 1, 1], [], []>} : vector<8x4xbf16>, vector<4x288xbf16>, vector<8x288xf32> -> vector<8x288xf32>
    %76 = arith.addf %71, %75 : vector<8x288xf32>
    %77 = vector.broadcast %4 : vector<8x1xf32> to vector<8x288xf32>
    %78 = arith.addf %76, %77 : vector<8x288xf32>
    %79 = vector.broadcast %26 : vector<1x288xf32> to vector<8x288xf32>
    %80 = arith.mulf %78, %79 : vector<8x288xf32>
    %cst_29 = arith.constant dense<0.000000e+00> : vector<8xf32>
    %81 = vector.multi_reduction <add>, %80, %cst_29 [1] : vector<8x288xf32> to vector<8xf32>
    %82 = vector.shape_cast %81 : vector<8xf32> to vector<8x1xf32>
    %cst_30 = arith.constant 3.906250e-03 : f32
    %83 = vector.broadcast %cst_30 : f32 to vector<8x1xf32>
    %84 = arith.mulf %82, %83 : vector<8x1xf32>
    %85 = vector.broadcast %84 : vector<8x1xf32> to vector<8x288xf32>
    %86 = arith.subf %78, %85 : vector<8x288xf32>
    %87 = arith.mulf %86, %86 : vector<8x288xf32>
    %88 = vector.broadcast %26 : vector<1x288xf32> to vector<8x288xf32>
    %89 = arith.mulf %87, %88 : vector<8x288xf32>
    %cst_31 = arith.constant dense<0.000000e+00> : vector<8xf32>
    %90 = vector.multi_reduction <add>, %89, %cst_31 [1] : vector<8x288xf32> to vector<8xf32>
    %91 = vector.shape_cast %90 : vector<8xf32> to vector<8x1xf32>
    %cst_32 = arith.constant 3.906250e-03 : f32
    %92 = vector.broadcast %cst_32 : f32 to vector<8x1xf32>
    %93 = arith.mulf %91, %92 : vector<8x1xf32>
    %cst_33 = arith.constant 9.99999974E-6 : f32
    %94 = vector.broadcast %cst_33 : f32 to vector<8x1xf32>
    %95 = arith.addf %93, %94 : vector<8x1xf32>
    %96 = math.rsqrt %95 : vector<8x1xf32>
    %97 = vector.broadcast %96 : vector<8x1xf32> to vector<8x288xf32>
    %98 = arith.mulf %86, %97 : vector<8x288xf32>
    %cst_34 = arith.constant 0.000000e+00 : f32
    %99 = vector.broadcast %cst_34 : f32 to vector<8x288xf32>
    %100 = arith.maximumf %98, %99 : vector<8x288xf32>
    %101 = vector.broadcast %26 : vector<1x288xf32> to vector<8x288xf32>
    %102 = arith.mulf %100, %101 : vector<8x288xf32>
    %c0_35 = arith.constant 0 : index
    %c19 = arith.constant 19 : index
    %103 = vector.load %arg7[%c0_35, %c19] : memref<8x342xf32, #tpu.memory_space<vmem>>, vector<8x288xf32>
    tpu.vector_store %arg7[%c0_35, %c19], %102 {strides = array<i32>} : memref<8x342xf32, #tpu.memory_space<vmem>>, vector<8x288xf32>,
    %c0_36 = arith.constant 0 : index
    %c0_37 = arith.constant 0 : index
    %104 = vector.load %arg7[%c0_36, %c0_37] : memref<8x342xf32, #tpu.memory_space<vmem>>, vector<8x342xf32>
    %105 = arith.truncf %104 : vector<8x342xf32> to vector<8x342xbf16>
    %cst_38 = arith.constant 0.000000e+00 : f32
    %106 = vector.broadcast %cst_38 : f32 to vector<8x288xf32>
    %107 = vector.extract_strided_slice %3 {offsets = [0, 0, 0], sizes = [1, 8, 8], strides = [1, 1, 1]} : vector<9x8x8xbf16> to vector<1x8x8xbf16>
    %108 = vector.shape_cast %107 : vector<1x8x8xbf16> to vector<8x8xbf16>
    %109 = vector.extract_strided_slice %105 {offsets = [0, 0], sizes = [8, 288], strides = [1, 1]} : vector<8x342xbf16> to vector<8x288xbf16>
    %cst_39 = arith.constant dense<0.000000e+00> : vector<8x288xf32>
    %110 = tpu.matmul %108, %109, %cst_39 {dimension_numbers = #tpu.dot_dimension_numbers<[1], [0], [0], [1], [0, 0, 1, 1], [], []>} : vector<8x8xbf16>, vector<8x288xbf16>, vector<8x288xf32> -> vector<8x288xf32>
    %111 = arith.addf %106, %110 : vector<8x288xf32>
    %112 = vector.extract_strided_slice %3 {offsets = [1, 0, 0], sizes = [1, 8, 8], strides = [1, 1, 1]} : vector<9x8x8xbf16> to vector<1x8x8xbf16>
    %113 = vector.shape_cast %112 : vector<1x8x8xbf16> to vector<8x8xbf16>
    %114 = vector.extract_strided_slice %105 {offsets = [0, 1], sizes = [8, 288], strides = [1, 1]} : vector<8x342xbf16> to vector<8x288xbf16>
    %cst_40 = arith.constant dense<0.000000e+00> : vector<8x288xf32>
    %115 = tpu.matmul %113, %114, %cst_40 {dimension_numbers = #tpu.dot_dimension_numbers<[1], [0], [0], [1], [0, 0, 1, 1], [], []>} : vector<8x8xbf16>, vector<8x288xbf16>, vector<8x288xf32> -> vector<8x288xf32>
    %116 = arith.addf %111, %115 : vector<8x288xf32>
    %117 = vector.extract_strided_slice %3 {offsets = [2, 0, 0], sizes = [1, 8, 8], strides = [1, 1, 1]} : vector<9x8x8xbf16> to vector<1x8x8xbf16>
    %118 = vector.shape_cast %117 : vector<1x8x8xbf16> to vector<8x8xbf16>
    %119 = vector.extract_strided_slice %105 {offsets = [0, 2], sizes = [8, 288], strides = [1, 1]} : vector<8x342xbf16> to vector<8x288xbf16>
    %cst_41 = arith.constant dense<0.000000e+00> : vector<8x288xf32>
    %120 = tpu.matmul %118, %119, %cst_41 {dimension_numbers = #tpu.dot_dimension_numbers<[1], [0], [0], [1], [0, 0, 1, 1], [], []>} : vector<8x8xbf16>, vector<8x288xbf16>, vector<8x288xf32> -> vector<8x288xf32>
    %121 = arith.addf %116, %120 : vector<8x288xf32>
    %122 = vector.extract_strided_slice %3 {offsets = [3, 0, 0], sizes = [1, 8, 8], strides = [1, 1, 1]} : vector<9x8x8xbf16> to vector<1x8x8xbf16>
    %123 = vector.shape_cast %122 : vector<1x8x8xbf16> to vector<8x8xbf16>
    %124 = vector.extract_strided_slice %105 {offsets = [0, 18], sizes = [8, 288], strides = [1, 1]} : vector<8x342xbf16> to vector<8x288xbf16>
    %cst_42 = arith.constant dense<0.000000e+00> : vector<8x288xf32>
    %125 = tpu.matmul %123, %124, %cst_42 {dimension_numbers = #tpu.dot_dimension_numbers<[1], [0], [0], [1], [0, 0, 1, 1], [], []>} : vector<8x8xbf16>, vector<8x288xbf16>, vector<8x288xf32> -> vector<8x288xf32>
    %126 = arith.addf %121, %125 : vector<8x288xf32>
    %127 = vector.extract_strided_slice %3 {offsets = [4, 0, 0], sizes = [1, 8, 8], strides = [1, 1, 1]} : vector<9x8x8xbf16> to vector<1x8x8xbf16>
    %128 = vector.shape_cast %127 : vector<1x8x8xbf16> to vector<8x8xbf16>
    %129 = vector.extract_strided_slice %105 {offsets = [0, 19], sizes = [8, 288], strides = [1, 1]} : vector<8x342xbf16> to vector<8x288xbf16>
    %cst_43 = arith.constant dense<0.000000e+00> : vector<8x288xf32>
    %130 = tpu.matmul %128, %129, %cst_43 {dimension_numbers = #tpu.dot_dimension_numbers<[1], [0], [0], [1], [0, 0, 1, 1], [], []>} : vector<8x8xbf16>, vector<8x288xbf16>, vector<8x288xf32> -> vector<8x288xf32>
    %131 = arith.addf %126, %130 : vector<8x288xf32>
    %132 = vector.extract_strided_slice %3 {offsets = [5, 0, 0], sizes = [1, 8, 8], strides = [1, 1, 1]} : vector<9x8x8xbf16> to vector<1x8x8xbf16>
    %133 = vector.shape_cast %132 : vector<1x8x8xbf16> to vector<8x8xbf16>
    %134 = vector.extract_strided_slice %105 {offsets = [0, 20], sizes = [8, 288], strides = [1, 1]} : vector<8x342xbf16> to vector<8x288xbf16>
    %cst_44 = arith.constant dense<0.000000e+00> : vector<8x288xf32>
    %135 = tpu.matmul %133, %134, %cst_44 {dimension_numbers = #tpu.dot_dimension_numbers<[1], [0], [0], [1], [0, 0, 1, 1], [], []>} : vector<8x8xbf16>, vector<8x288xbf16>, vector<8x288xf32> -> vector<8x288xf32>
    %136 = arith.addf %131, %135 : vector<8x288xf32>
    %137 = vector.extract_strided_slice %3 {offsets = [6, 0, 0], sizes = [1, 8, 8], strides = [1, 1, 1]} : vector<9x8x8xbf16> to vector<1x8x8xbf16>
    %138 = vector.shape_cast %137 : vector<1x8x8xbf16> to vector<8x8xbf16>
    %139 = vector.extract_strided_slice %105 {offsets = [0, 36], sizes = [8, 288], strides = [1, 1]} : vector<8x342xbf16> to vector<8x288xbf16>
    %cst_45 = arith.constant dense<0.000000e+00> : vector<8x288xf32>
    %140 = tpu.matmul %138, %139, %cst_45 {dimension_numbers = #tpu.dot_dimension_numbers<[1], [0], [0], [1], [0, 0, 1, 1], [], []>} : vector<8x8xbf16>, vector<8x288xbf16>, vector<8x288xf32> -> vector<8x288xf32>
    %141 = arith.addf %136, %140 : vector<8x288xf32>
    %142 = vector.extract_strided_slice %3 {offsets = [7, 0, 0], sizes = [1, 8, 8], strides = [1, 1, 1]} : vector<9x8x8xbf16> to vector<1x8x8xbf16>
    %143 = vector.shape_cast %142 : vector<1x8x8xbf16> to vector<8x8xbf16>
    %144 = vector.extract_strided_slice %105 {offsets = [0, 37], sizes = [8, 288], strides = [1, 1]} : vector<8x342xbf16> to vector<8x288xbf16>
    %cst_46 = arith.constant dense<0.000000e+00> : vector<8x288xf32>
    %145 = tpu.matmul %143, %144, %cst_46 {dimension_numbers = #tpu.dot_dimension_numbers<[1], [0], [0], [1], [0, 0, 1, 1], [], []>} : vector<8x8xbf16>, vector<8x288xbf16>, vector<8x288xf32> -> vector<8x288xf32>
    %146 = arith.addf %141, %145 : vector<8x288xf32>
    %147 = vector.extract_strided_slice %3 {offsets = [8, 0, 0], sizes = [1, 8, 8], strides = [1, 1, 1]} : vector<9x8x8xbf16> to vector<1x8x8xbf16>
    %148 = vector.shape_cast %147 : vector<1x8x8xbf16> to vector<8x8xbf16>
    %149 = vector.extract_strided_slice %105 {offsets = [0, 38], sizes = [8, 288], strides = [1, 1]} : vector<8x342xbf16> to vector<8x288xbf16>
    %cst_47 = arith.constant dense<0.000000e+00> : vector<8x288xf32>
    %150 = tpu.matmul %148, %149, %cst_47 {dimension_numbers = #tpu.dot_dimension_numbers<[1], [0], [0], [1], [0, 0, 1, 1], [], []>} : vector<8x8xbf16>, vector<8x288xbf16>, vector<8x288xf32> -> vector<8x288xf32>
    %151 = arith.addf %146, %150 : vector<8x288xf32>
    %152 = vector.broadcast %5 : vector<8x1xf32> to vector<8x288xf32>
    %153 = arith.addf %151, %152 : vector<8x288xf32>
    %154 = vector.broadcast %26 : vector<1x288xf32> to vector<8x288xf32>
    %155 = arith.mulf %153, %154 : vector<8x288xf32>
    %cst_48 = arith.constant dense<0.000000e+00> : vector<8xf32>
    %156 = vector.multi_reduction <add>, %155, %cst_48 [1] : vector<8x288xf32> to vector<8xf32>
    %157 = vector.shape_cast %156 : vector<8xf32> to vector<8x1xf32>
    %cst_49 = arith.constant 3.906250e-03 : f32
    %158 = vector.broadcast %cst_49 : f32 to vector<8x1xf32>
    %159 = arith.mulf %157, %158 : vector<8x1xf32>
    %160 = vector.broadcast %159 : vector<8x1xf32> to vector<8x288xf32>
    %161 = arith.subf %153, %160 : vector<8x288xf32>
    %162 = arith.mulf %161, %161 : vector<8x288xf32>
    %163 = vector.broadcast %26 : vector<1x288xf32> to vector<8x288xf32>
    %164 = arith.mulf %162, %163 : vector<8x288xf32>
    %cst_50 = arith.constant dense<0.000000e+00> : vector<8xf32>
    %165 = vector.multi_reduction <add>, %164, %cst_50 [1] : vector<8x288xf32> to vector<8xf32>
    %166 = vector.shape_cast %165 : vector<8xf32> to vector<8x1xf32>
    %cst_51 = arith.constant 3.906250e-03 : f32
    %167 = vector.broadcast %cst_51 : f32 to vector<8x1xf32>
    %168 = arith.mulf %166, %167 : vector<8x1xf32>
    %cst_52 = arith.constant 9.99999974E-6 : f32
    %169 = vector.broadcast %cst_52 : f32 to vector<8x1xf32>
    %170 = arith.addf %168, %169 : vector<8x1xf32>
    %171 = math.rsqrt %170 : vector<8x1xf32>
    %172 = vector.broadcast %171 : vector<8x1xf32> to vector<8x288xf32>
    %173 = arith.mulf %161, %172 : vector<8x288xf32>
    %cst_53 = arith.constant 0.000000e+00 : f32
    %174 = vector.broadcast %cst_53 : f32 to vector<8x288xf32>
    %175 = arith.maximumf %173, %174 : vector<8x288xf32>
    %176 = vector.broadcast %26 : vector<1x288xf32> to vector<8x288xf32>
    %177 = arith.mulf %175, %176 : vector<8x288xf32>
    %c0_54 = arith.constant 0 : index
    %c0_55 = arith.constant 0 : index
    %c0_56 = arith.constant 0 : index
    %178 = vector.load %arg6[%c0_54, %c0_55, %c0_56] : memref<1x8x288xf32, #tpu.memory_space<vmem>>, vector<1x8x288xf32>
    %179 = vector.shape_cast %178 : vector<1x8x288xf32> to vector<8x288xf32>
    %180 = vector.shape_cast %177 : vector<8x288xf32> to vector<1x8x288xf32>
    tpu.vector_store %arg6[%c0_54, %c0_55, %c0_56], %180 {strides = array<i32>} : memref<1x8x288xf32, #tpu.memory_space<vmem>>, vector<1x8x288xf32>,
    return
  }
  func.func @transform_0(%arg0: i32) -> (i32, i32, i32) {
    %c0_i32 = arith.constant 0 : i32
    %c0_i32_0 = arith.constant 0 : i32
    %c0_i32_1 = arith.constant 0 : i32
    return %arg0, %c0_i32, %c0_i32_0 : i32, i32, i32
  }
  func.func @transform_1(%arg0: i32) -> (i32, i32, i32) {
    %c0_i32 = arith.constant 0 : i32
    %c0_i32_0 = arith.constant 0 : i32
    %c0_i32_1 = arith.constant 0 : i32
    %c0_i32_2 = arith.constant 0 : i32
    return %c0_i32, %c0_i32_0, %c0_i32_1 : i32, i32, i32
  }
  func.func @transform_2(%arg0: i32) -> (i32, i32) {
    %c0_i32 = arith.constant 0 : i32
    %c0_i32_0 = arith.constant 0 : i32
    %c0_i32_1 = arith.constant 0 : i32
    return %c0_i32, %c0_i32_0 : i32, i32
  }
  func.func @transform_3(%arg0: i32) -> (i32, i32, i32) {
    %c0_i32 = arith.constant 0 : i32
    %c0_i32_0 = arith.constant 0 : i32
    %c0_i32_1 = arith.constant 0 : i32
    %c0_i32_2 = arith.constant 0 : i32
    return %c0_i32, %c0_i32_0, %c0_i32_1 : i32, i32, i32
  }
  func.func @transform_4(%arg0: i32) -> (i32, i32) {
    %c0_i32 = arith.constant 0 : i32
    %c0_i32_0 = arith.constant 0 : i32
    %c0_i32_1 = arith.constant 0 : i32
    return %c0_i32, %c0_i32_0 : i32, i32
  }
  func.func @transform_5(%arg0: i32) -> (i32, i32, i32) {
    %c0_i32 = arith.constant 0 : i32
    %c0_i32_0 = arith.constant 0 : i32
    %c0_i32_1 = arith.constant 0 : i32
    return %arg0, %c0_i32, %c0_i32_0 : i32, i32, i32
  }
}

</mosaic_0001>

<bundles_post_ra>
// kernel: tpu_custom_call.1
= control target key start
LH: loop header
LB: loop body
LE: loop exit
PB: predicated region body
PF: predicated region fallthrough
CT: control target
= control target key end

     0   :  { %10 = vsyncpa [#allocation4], 0  ;;  %s2411_s0 = inlined_call_operand.vmem [shape: bf16[2,4,342], index: 0, kind: input, shape index: {}]   ;;  %s2412_s1 = inlined_call_operand.vmem [shape: bf16[9,8,4], index: 1, kind: input, shape index: {}]   ;;  %s2413_s2 = inlined_call_operand.vmem [shape: f32[8,1], index: 2, kind: input, shape index: {}]   ;;  %s2414_s3 = inlined_call_operand.vmem [shape: bf16[9,8,8], index: 3, kind: input, shape index: {}]   ;;  %s2415_s4 = inlined_call_operand.vmem [shape: f32[8,1], index: 4, kind: input, shape index: {}]   ;;  %s2416_s5 = inlined_call_operand.hbm [shape: f32[2,8,288], index: 5, kind: output, shape index: {}]  }
   0x1   :  { %12 = vsyncpa [#allocation4 + $0x1], 0  ;;  %s1967_s18 = smov 0   ;;  %s1969_s19 = smov 0  }
   0x2   :  { %s1971_s20 = smov 0   ;;  %s1973_s21 = smov 0  }
   0x3 LB: > { %s1988_s22 = sadd.s32 4294967295, %s1924_s21   ;;  %s1738_s23 = sadd.s32 4294967294, %s1924_s21   ;;  %s1924_s21 = sphi %s1973_s21, %s2429_s21   ;;  %s1920_s20 = sphi %s1971_s20, %s2428_s20   ;;  %s1916_s19 = sphi %s1969_s19, %s2427_s19   ;;  %s1912_s18 = sphi %s1967_s18, %s2426_s18  }
   0x4   : > { %s1992_s24 = sadd.s32 1, %s1924_s21   ;;  %s135_s25 = sadd.s32 1, %s1920_s20 }
   0x5   : > { %s132_s26 = ssub.s32 %s1924_s21, %s1992_s24  ;;  %p145_p0 = scmp.ne.s32.totalorder %s1920_s20, %s1916_s19 }
   0x6   : > { %p133_p1 = scmp.eq.s32.totalorder %s132_s26, 0  ;;  %p146_p2 = scmp.eq.s32.totalorder %s1988_s22, 1 }
   0x7   : > { %p151_p3 = scmp.ne.s32.totalorder %s1916_s19, %s1912_s18  ;;  %p152_p4 = scmp.eq.s32.totalorder %s1738_s23, 1 }
   0x8   : > { %s2003_s27 = scalar_select %p133_p1, %s1920_s20, %s135_s25  }
   0x9   : > { %p2005_p5 = por %p146_p2, %p145_p0  ;;  %p2009_p6 = por %p152_p4, %p151_p3 }
   0xa   : > { %p1741_p7 = scmp.ge.s32.totalorder %s1924_s21, 1  ;;  %p190_p8 = scmp.lt.s32.totalorder %s1924_s21, 3 }
   0xc   : > { %p191_p9 = pnand %p1741_p7, %p190_p8 }
   0xd   : > { %p218_p10 = scmp.lt.s32.totalorder (!%p191_p9), %s1988_s22, 1  ;;  %s1926_s10 = smov (!%p191_p9), 127  }
   0xe   : > { %194 = sbr.rel (%p191_p9) target bundleno = 1440 (0x5a0), region = 40  ;;  %s1927_s11 = smov (!%p191_p9), 126  }
   0xf   : > { %s1928_s12 = smov (!%p191_p9), 110   ;;  %s1929_s13 = smov (!%p191_p9), 109  }
  0x10   : > { %s1930_s14 = smov (!%p191_p9), 108   ;;  %s1931_s15 = smov (!%p191_p9), 92  }
  0x11   : > { %s1932_s16 = smov (!%p191_p9), 91   ;;  %s1933_s17 = smov (!%p191_p9), 90  }
  0x13   : > { %s219_s30 = scalar_select %p218_p10, %s1988_s22, 1  ;;  %vm385_vm0 = vcmask 1041408   ;;  %vm381_vm1 = vcmask 31744   ;;  %v225_v29 = vld [vmem:[%s2412_s1] sm:$0xf]  ;;  %vm378_vm2 = vcmask 1039360  }
  0x14   : > { %v226_v37 = vld [vmem:[%s2412_s1 + $0x4] sm:$0xf]  ;;  %vm499_vm3 = vcmask 1031168   ;;  %v227_v41 = vld [vmem:[%s2412_s1 + $0x8] sm:$0xf]  ;;  %vm569_vm4 = vcmask 900096  }
  0x15   : > { %s1804_s6 = smul.u32 6, %s219_s30  ;;  %v228_v58 = vld [vmem:[%s2412_s1 + $0xc] sm:$0xf]  ;;  %vm639_vm5 = vcmask 891904   ;;  %vm709_vm6 = vcmask 883712   ;;  %vm779_vm7 = vcmask 752640  }
  0x16   : > { %vm849_vm8 = vcmask 744448   ;;  %vm2417_vm9 = vcmask 736256  }
  0x17   : > { %s222_s9 = scalar_lea.vmem %s2411_s0, %s1804_s6  ;;  %s1936_s6 = smov 19  }
  0x18   : > { %v224_v0 = vld [vmem:[%s222_s9] sm:$0x3f] }
  0x19   : > { %365 = vst [vmem:[#allocation1] ss:$4 sm:$0xff] %v224_v0 }
  0x20   : > { %v370_v1 = vld.sshfl [vmem:[#allocation1 + $0x10] sm:$0xff pattern:$0x73625140]  ;;  %v368_v2 = vld.sshfl [vmem:[#allocation1 + $0x8] sm:$0xff pattern:$0x73625140] }
  0x21   : > { %376 = vrot.lane.b32.xlu0 %v370_v1, %s1926_s10  ;;  %374 = vrot.lane.b32.xlu1 %v368_v2, %s1926_s10  ;;  %v366_v3 = vld.sshfl [vmem:[#allocation1] sm:$0xff pattern:$0x73625140] }
  0x22   : > { %434 = vst [vmem:[#allocation1] ss:$4 sm:$0xff] %v224_v0 }
  0x29   : > { %372 = vrot.lane.b32.xlu0 %v366_v3, %s1926_s10  ;;  %v435_v4 = vld.sshfl [vmem:[#allocation1] sm:$0xff pattern:$0x73625140]  ;;  %v2023_v5 = vld.sshfl [vmem:[#allocation1 + $0x8] sm:$0xff pattern:$0x73625140] }
  0x2a   : > { %v2025_v6 = vld.sshfl [vmem:[#allocation1 + $0x10] sm:$0xff pattern:$0x73625140]  ;;  %v441_v27 = vsel %vm385_vm0, %v435_v4, 0  ;;  %v443_v44 = vsel %vm385_vm0, %v2023_v5, 0 }
  0x2b   : > { %486 = vst [vmem:[#allocation1] ss:$4 sm:$0xff] %v224_v0  ;;  %454 = vmatpush.bf16.msra.mxu3 %v441_v27  ;;  %v445_v35 = vsel %vm385_vm0, %v2025_v6, 0  ;;  %v231_v27 = vld [vmem:[%s2412_s1 + $0x18] sm:$0xf] }
  0x2e   : > { %1749 = vmatmul.msk.bf16.vlgmr.msra.gmra.mxu3 %vm381_vm1, %v225_v29 }
  0x32   : > { %v487_v7 = vld.sshfl [vmem:[#allocation1] sm:$0xff pattern:$0x73625140]  ;;  %v489_v8 = vld.sshfl [vmem:[#allocation1 + $0x8] sm:$0xff pattern:$0x73625140] }
  0x33   : > { %493 = vrot.lane.b32.xlu1 %v487_v7, %s1927_s11  ;;  %v491_v9 = vld.sshfl [vmem:[#allocation1 + $0x10] sm:$0xff pattern:$0x73625140]  ;;  %495 = vrot.lane.b32.xlu2 %v489_v8, %s1927_s11 }
  0x34   : > { %556 = vst [vmem:[#allocation1] ss:$4 sm:$0xff] %v224_v0  ;;  %v230_v8 = vld [vmem:[%s2412_s1 + $0x14] sm:$0xf] }
  0x3b   : > { %v561_v10 = vld.sshfl [vmem:[#allocation1 + $0x10] sm:$0xff pattern:$0x73625140]  ;;  %v557_v11 = vld.sshfl [vmem:[#allocation1] sm:$0xff pattern:$0x73625140]  ;;  %497 = vrot.lane.b32.xlu2 %v491_v9, %s1927_s11 }
  0x3c   : > { %567 = vrot.lane.b32.xlu1 %v561_v10, %s1928_s12  ;;  %v559_v12 = vld.sshfl [vmem:[#allocation1 + $0x8] sm:$0xff pattern:$0x73625140]  ;;  %v229_v9 = vld [vmem:[%s2412_s1 + $0x10] sm:$0xf] }
  0x3d   : > { %565 = vrot.lane.b32.xlu0 %v559_v12, %s1928_s12  ;;  %626 = vst [vmem:[#allocation1] ss:$4 sm:$0xff] %v224_v0 }
  0x43   : > { %563 = vrot.lane.b32.xlu2 %v557_v11, %s1928_s12 }
  0x44   : > { %v631_v13 = vld.sshfl [vmem:[#allocation1 + $0x10] sm:$0xff pattern:$0x73625140]  ;;  %v629_v14 = vld.sshfl [vmem:[#allocation1 + $0x8] sm:$0xff pattern:$0x73625140] }
  0x45   : > { %637 = vrot.lane.b32.xlu0 %v631_v13, %s1929_s13  ;;  %v627_v15 = vld.sshfl [vmem:[#allocation1] sm:$0xff pattern:$0x73625140] }
  0x46   : > { %633 = vrot.lane.b32.xlu1 %v627_v15, %s1929_s13  ;;  %696 = vst [vmem:[#allocation1] ss:$4 sm:$0xff] %v224_v0 }
  0x4b   : > { %635 = vrot.lane.b32.xlu2 %v629_v14, %s1929_s13 }
  0x4d   : > { %v699_v16 = vld.sshfl [vmem:[#allocation1 + $0x8] sm:$0xff pattern:$0x73625140]  ;;  %v697_v17 = vld.sshfl [vmem:[#allocation1] sm:$0xff pattern:$0x73625140] }
  0x4e   : > { %705 = vrot.lane.b32.xlu1 %v699_v16, %s1930_s14  ;;  %703 = vrot.lane.b32.xlu0 %v697_v17, %s1930_s14  ;;  %v701_v18 = vld.sshfl [vmem:[#allocation1 + $0x10] sm:$0xff pattern:$0x73625140] }
  0x4f   : > { %766 = vst [vmem:[#allocation1] ss:$4 sm:$0xff] %v224_v0 }
  0x56   : > { %707 = vrot.lane.b32.xlu1 %v701_v18, %s1930_s14  ;;  %v767_v19 = vld.sshfl [vmem:[#allocation1] sm:$0xff pattern:$0x73625140]  ;;  %v771_v20 = vld.sshfl [vmem:[#allocation1 + $0x10] sm:$0xff pattern:$0x73625140] }
  0x57   : > { %v769_v21 = vld.sshfl [vmem:[#allocation1 + $0x8] sm:$0xff pattern:$0x73625140]  ;;  %773 = vrot.lane.b32.xlu2 %v767_v19, %s1931_s15 }
  0x58   : > { %775 = vrot.lane.b32.xlu0 %v769_v21, %s1931_s15  ;;  %836 = vst [vmem:[#allocation1] ss:$4 sm:$0xff] %v224_v0 }
  0x5f   : > { %v837_v22 = vld.sshfl [vmem:[#allocation1] sm:$0xff pattern:$0x73625140]  ;;  %v841_v23 = vld.sshfl [vmem:[#allocation1 + $0x10] sm:$0xff pattern:$0x73625140]  ;;  %777 = vrot.lane.b32.xlu2 %v771_v20, %s1931_s15 }
  0x60   : > { %847 = vrot.lane.b32.xlu1 %v841_v23, %s1932_s16  ;;  %v839_v24 = vld.sshfl [vmem:[#allocation1 + $0x8] sm:$0xff pattern:$0x73625140] }
  0x61   : > { %845 = vrot.lane.b32.xlu0 %v839_v24, %s1932_s16  ;;  %906 = vst [vmem:[#allocation1] ss:$4 sm:$0xff] %v224_v0 }
  0x67   : > { %843 = vrot.lane.b32.xlu2 %v837_v22, %s1932_s16 }
  0x68   : > { %v911_v25 = vld.sshfl [vmem:[#allocation1 + $0x10] sm:$0xff pattern:$0x73625140]  ;;  %v907_v26 = vld.sshfl [vmem:[#allocation1] sm:$0xff pattern:$0x73625140] }
  0x69   : > { %917 = vrot.lane.b32.xlu0 %v911_v25, %s1933_s17  ;;  %913 = vrot.lane.b32.xlu1 %v907_v26, %s1933_s17  ;;  %v909_v28 = vld.sshfl [vmem:[#allocation1 + $0x8] sm:$0xff pattern:$0x73625140] }
  0x6f   : > { %915 = vrot.lane.b32.xlu2 %v909_v28, %s1933_s17 }
  0x8d   : > { %v496_v30 = vpop.permute.xlu2 %495 }
  0x93   : > { %v377_v31 = vpop.permute.xlu0 %376  ;;  %v375_v32 = vpop.permute.xlu1 %374 }
  0x94   : > { %v393_v33 = vsel %vm385_vm0, %v377_v31, 0  ;;  %v380_v34 = vsel %vm378_vm2, %v375_v32, %v377_v31 }
  0x95   : > { %428 = vmatpush.bf16.msra.mxu2 %v393_v33  ;;  %v390_v36 = vsel %vm385_vm0, %v380_v34, 0  ;;  %v498_v38 = vpop.permute.xlu2 %497 }
  0x96   : > { %415 = vmatpush.bf16.msra.mxu1 %v390_v36  ;;  %v501_v39 = vsel %vm499_vm3, %v496_v30, %v498_v38  ;;  %v512_v46 = vsel %vm385_vm0, %v498_v38, 0  ;;  %v243_v38 = vld [vmem:[%s2413_s2] sm:$0xff] }
  0x97   : > { %v509_v40 = vsel %vm385_vm0, %v501_v39, 0  ;;  %v1934_v39 = vmov 0  }
  0x98   : > { %1748 = vmatmul.msk.bf16.vlgmr.msra.gmra.mxu2 %vm381_vm1, %v226_v37  ;;  %534 = vmatpush.bf16.msrb.mxu3 %v509_v40  ;;  %v232_v40 = vld [vmem:[%s2412_s1 + $0x1c] sm:$0xf] }
  0x99   : > { %1747 = vmatmul.msk.bf16.vlgmr.msra.gmra.mxu1 %vm381_vm1, %v226_v37  ;;  %1856 = vset.pattern.permute.xlu0 %v1934_v39 }
  0x9a   : > { %480 = vmatpush.bf16.msrb.mxu1 %v445_v35  ;;  %978 = vperm.xlu0 %1856, %v243_v38  }
  0x9b   : > { %v373_v42 = vpop.permute.xlu0 %372  ;;  %1753 = vmatmul.msk.bf16.vlgmr.msrb.gmra.mxu3 %vm381_vm1, %v227_v41  ;;  %1857 = vset.pattern.permute.xlu2 %v1934_v39 }
  0x9c   : > { %v379_v43 = vsel %vm378_vm2, %v373_v42, %v375_v32 }
  0x9d   : > { %v387_v45 = vsel %vm385_vm0, %v379_v43, 0  ;;  %v564_v50 = vpop.permute.xlu2 %563 }
  0x9e   : > { %402 = vmatpush.bf16.msra.mxu0 %v387_v45 }
  0xa1   : > { %1746 = vmatmul.msk.bf16.vlgmr.msra.gmra.mxu0 %vm381_vm1, %v226_v37 }
  0xa2   : > { %467 = vmatpush.bf16.msrb.mxu0 %v443_v44 }
  0xa5   : > { %v494_v47 = vpop.permute.xlu1 %493  ;;  %v636_v59 = vpop.permute.xlu2 %635 }
  0xa6   : > { %547 = vmatpush.bf16.msra.mxu0 %v512_v46  ;;  %v500_v48 = vsel %vm499_vm3, %v494_v47, %v496_v30 }
  0xa7   : > { %v506_v49 = vsel %vm385_vm0, %v500_v48, 0 }
  0xa8   : > { %521 = vmatpush.bf16.msrb.mxu2 %v506_v49 }
  0xa9   : > { %1751 = vmatmul.msk.bf16.vlgmr.msrb.gmra.mxu1 %vm381_vm1, %v225_v29 }
  0xab   : > { %1752 = vmatmul.msk.bf16.vlgmr.msrb.gmra.mxu2 %vm381_vm1, %v227_v41 }
  0xae   : > { %v568_v51 = vpop.permute.xlu1 %567 }
  0xaf   : > { %v582_v52 = vsel %vm385_vm0, %v568_v51, 0  ;;  %v566_v53 = vpop.permute.xlu0 %565 }
  0xb0   : > { %v571_v54 = vsel %vm569_vm4, %v566_v53, %v568_v51  ;;  %v570_v55 = vsel %vm569_vm4, %v564_v50, %v566_v53  ;;  %617 = vmatpush.bf16.msra.mxu3 %v582_v52 }
  0xb1   : > { %1750 = vmatmul.msk.bf16.vlgmr.msrb.gmra.mxu0 %vm381_vm1, %v225_v29  ;;  %v579_v56 = vsel %vm385_vm0, %v571_v54, 0  ;;  %v576_v57 = vsel %vm385_vm0, %v570_v55, 0  ;;  %v774_v3 = vpop.permute.xlu2 %773  ;;  %v456_v42 = vpop.f32.mrf.mxu3 }
  0xb2   : > { %591 = vmatpush.bf16.msra.mxu1 %v576_v57  ;;  %604 = vmatpush.bf16.msra.mxu2 %v579_v56 }
  0xb3   : > { %1757 = vmatmul.msk.bf16.vlgmr.msra.gmra.mxu3 %vm381_vm1, %v228_v58 }
  0xb7   : > { %v638_v60 = vpop.permute.xlu0 %637 }
  0xb8   : > { %v652_v61 = vsel %vm385_vm0, %v638_v60, 0  ;;  %v634_v62 = vpop.permute.xlu1 %633  ;;  %v641_v63 = vsel %vm639_vm5, %v636_v59, %v638_v60 }
  0xb9   : > { %1755 = vmatmul.msk.bf16.vlgmr.msra.gmra.mxu1 %vm381_vm1, %v228_v58  ;;  %v640_v0 = vsel %vm639_vm5, %v634_v62, %v636_v59  ;;  %v649_v1 = vsel %vm385_vm0, %v641_v63, 0  ;;  %687 = vmatpush.bf16.msrb.mxu2 %v652_v61  ;;  %v778_v11 = vpop.permute.xlu2 %777  ;;  %v458_v43 = vpop.f32.mrf.mxu3 }
  0xba   : > { %v646_v2 = vsel %vm385_vm0, %v640_v0, 0  ;;  %674 = vmatpush.bf16.msrb.mxu1 %v649_v1  ;;  %v792_v20 = vsel %vm385_vm0, %v778_v11, 0  ;;  %v245_v1 = vlaneseq }
  0xbb   : > { %1756 = vmatmul.msk.bf16.vlgmr.msra.gmra.mxu2 %vm381_vm1, %v228_v58  ;;  %661 = vmatpush.bf16.msrb.mxu0 %v646_v2 }
  0xbc   : > { %v2162_v2 = vand.u32 127, %v245_v1 }
  0xc0   : > { %v706_v4 = vpop.permute.xlu1 %705  ;;  %v704_v5 = vpop.permute.xlu0 %703 }
  0xc1   : > { %1754 = vmatmul.msk.bf16.vlgmr.msra.gmra.mxu0 %vm381_vm1, %v227_v41  ;;  %v710_v6 = vsel %vm709_vm6, %v704_v5, %v706_v4  ;;  %v844_v21 = vpop.permute.xlu2 %843  ;;  %v233_v41 = vld [vmem:[%s2412_s1 + $0x20] sm:$0xf] }
  0xc2   : > { %v716_v7 = vsel %vm385_vm0, %v710_v6, 0 }
  0xc3   : > { %731 = vmatpush.bf16.msrb.mxu3 %v716_v7  ;;  %v2169_v7 = vadd.s32 128, %v2162_v2 }
  0xc6   : > { %1761 = vmatmul.msk.bf16.vlgmr.msrb.gmra.mxu3 %vm381_vm1, %v230_v8 }
  0xc8   : > { %v708_v10 = vpop.permute.xlu1 %707 }
  0xc9   : > { %1759 = vmatmul.msk.bf16.vlgmr.msrb.gmra.mxu1 %vm381_vm1, %v229_v9  ;;  %v711_v12 = vsel %vm709_vm6, %v706_v4, %v708_v10  ;;  %v722_v13 = vsel %vm385_vm0, %v708_v10, 0  ;;  %v916_v30 = vpop.permute.xlu2 %915 }
  0xca   : > { %v719_v14 = vsel %vm385_vm0, %v711_v12, 0  ;;  %v776_v15 = vpop.permute.xlu0 %775  ;;  %757 = vmatpush.bf16.msra.mxu1 %v722_v13  ;;  %v2174_v12 = vadd.s32 256, %v2162_v2 }
  0xcb   : > { %1760 = vmatmul.msk.bf16.vlgmr.msrb.gmra.mxu2 %vm381_vm1, %v229_v9  ;;  %v780_v16 = vsel %vm779_vm7, %v774_v3, %v776_v15  ;;  %744 = vmatpush.bf16.msra.mxu0 %v719_v14  ;;  %v781_v17 = vsel %vm779_vm7, %v776_v15, %v778_v11  ;;  %v282_v14 = vshrl.u32 %v2169_v7, 16 }
  0xcc   : > { %v786_v18 = vsel %vm385_vm0, %v780_v16, 0  ;;  %v789_v19 = vsel %vm385_vm0, %v781_v17, 0 }
  0xcd   : > { %801 = vmatpush.bf16.msra.mxu2 %v786_v18  ;;  %814 = vmatpush.bf16.msra.mxu3 %v789_v19  ;;  %v310_v18 = vand.u32 65535, %v2174_v12  ;;  %v311_v19 = vshrl.u32 %v2174_v12, 16 }
  0xd1   : > { %1758 = vmatmul.msk.bf16.vlgmr.msrb.gmra.mxu0 %vm381_vm1, %v229_v9  ;;  %v252_v9 = vand.u32 65535, %v2162_v2 }
  0xd2   : > { %v848_v22 = vpop.permute.xlu1 %847  ;;  %827 = vmatpush.bf16.msrb.mxu0 %v792_v20  ;;  %v314_v20 = vmul.u32 58254, %v310_v18 }
  0xd3   : > { %v862_v23 = vsel %vm385_vm0, %v848_v22, 0  ;;  %v846_v24 = vpop.permute.xlu0 %845  ;;  %v256_v16 = vmul.u32 58254, %v252_v9 }
  0xd4   : > { %v851_v25 = vsel %vm849_vm8, %v846_v24, %v848_v22  ;;  %v850_v26 = vsel %vm849_vm8, %v844_v21, %v846_v24  ;;  %897 = vmatpush.bf16.msrb.mxu3 %v862_v23  ;;  %v253_v21 = vshrl.u32 %v2162_v2, 16  ;;  %v286_v23 = vmul.u32 14564, %v282_v14 }
  0xd5   : > { %v859_v28 = vsel %vm385_vm0, %v851_v25, 0  ;;  %v856_v29 = vsel %vm385_vm0, %v850_v26, 0  ;;  %v255_v25 = vmul.u32 14564, %v252_v9  ;;  %v259_v26 = vshll.u32 %v256_v16, 16 }
  0xd6   : > { %1765 = vmatmul.msk.bf16.vlgmr.msra.gmra.mxu3 %vm381_vm1, %v231_v27  ;;  %871 = vmatpush.bf16.msrb.mxu1 %v856_v29  ;;  %v257_v29 = vmul.u32 14564, %v253_v21  ;;  %v258_v43 = vmul.u32 58254, %v253_v21  ;;  %v260_v1 = vshrl.u32 %v256_v16, 16 }
  0xd7   : > { %884 = vmatpush.bf16.msrb.mxu2 %v859_v28  ;;  %vm263_vm11 = vc.u32 %v255_v25, %v259_v26  ;;  %v265_v38 = vadd.s32 %v259_v26, %v255_v25 }
  0xd9   : > { %1763 = vmatmul.msk.bf16.vlgmr.msra.gmra.mxu1 %vm381_vm1, %v230_v8 }
  0xdb   : > { %1764 = vmatmul.msk.bf16.vlgmr.msra.gmra.mxu2 %vm381_vm1, %v231_v27  ;;  %v918_v31 = vpop.permute.xlu0 %917  ;;  %v914_v32 = vpop.permute.xlu1 %913 }
  0xdc   : > { %v932_v33 = vsel %vm385_vm0, %v918_v31, 0  ;;  %v921_v34 = vsel %vm2417_vm9, %v916_v30, %v918_v31  ;;  %v920_v35 = vsel %vm2417_vm9, %v914_v32, %v916_v30  ;;  %v313_v30 = vmul.u32 14564, %v310_v18 }
  0xdd   : > { %v929_v36 = vsel %vm385_vm0, %v921_v34, 0  ;;  %967 = vmatpush.bf16.msra.mxu2 %v932_v33  ;;  %v926_v37 = vsel %vm385_vm0, %v920_v35, 0  ;;  %v315_v31 = vmul.u32 14564, %v311_v19  ;;  %v317_v32 = vshll.u32 %v314_v20, 16 }
  0xde   : > { %954 = vmatpush.bf16.msra.mxu1 %v929_v36  ;;  %v290_v34 = vshll.u32 %v286_v23, 16 }
  0xdf   : > { %vm321_vm12 = vc.u32 %v313_v30, %v317_v32 }
  0xe1   : > { %1762 = vmatmul.msk.bf16.vlgmr.msra.gmra.mxu0 %vm381_vm1, %v230_v8  ;;  %v281_v8 = vand.u32 65535, %v2169_v7 }
  0xe2   : > { %941 = vmatpush.bf16.msra.mxu0 %v926_v37  ;;  %v261_v37 = vshll.u32 %v257_v29, 16 }
  0xe3   : > { %v285_v15 = vmul.u32 58254, %v281_v8  ;;  %v284_v22 = vmul.u32 14564, %v281_v8 }
  0xe4   : > { %vm267_vm14 = vc.u32 %v265_v38, %v261_v37 }
  0xe5   : > { %v288_v24 = vshll.u32 %v285_v15, 16 }
  0xe6   : > { %1769 = vmatmul.msk.bf16.vlgmr.msrb.gmra.mxu3 %vm381_vm1, %v232_v40 }
  0xe7   : > { %vm292_vm10 = vc.u32 %v284_v22, %v288_v24  ;;  %v294_v35 = vadd.s32 %v288_v24, %v284_v22  ;;  %v320_v22 = vshrl.u32 %v315_v31, 16 }
  0xe9   : > { %1767 = vmatmul.msk.bf16.vlgmr.msrb.gmra.mxu1 %vm381_vm1, %v232_v40  ;;  %vm296_vm13 = vc.u32 %v294_v35, %v290_v34 }
  0xeb   : > { %1768 = vmatmul.msk.bf16.vlgmr.msrb.gmra.mxu2 %vm381_vm1, %v232_v40  ;;  %v287_v40 = vmul.u32 58254, %v282_v14 }
  0xf1   : > { %1766 = vmatmul.msk.bf16.vlgmr.msrb.gmra.mxu0 %vm381_vm1, %v231_v27 }
  0xf9   : > { %1771 = vmatmul.msk.bf16.vlgmr.msra.gmra.mxu1 %vm381_vm1, %v233_v41 }
  0xfb   : > { %1772 = vmatmul.msk.bf16.vlgmr.msra.gmra.mxu2 %vm381_vm1, %v233_v41 }
 0x101   : > { %1770 = vmatmul.msk.bf16.vlgmr.msra.gmra.mxu0 %vm381_vm1, %v233_v41  ;;  %v319_v41 = vshll.u32 %v315_v31, 16 }
 0x116   : > { %v417_v44 = vpop.f32.mrf.mxu1 }
 0x11b   : > { %v430_v45 = vpop.f32.mrf.mxu2 }
 0x11e   : > { %v404_v46 = vpop.f32.mrf.mxu0  ;;  %v419_v47 = vpop.f32.mrf.mxu1 }
 0x11f   : > { %v457_v48 = vadd.f32 %v456_v42, %v404_v46  ;;  %v536_v49 = vpop.f32.mrf.mxu3  ;;  %v323_v42 = vadd.s32 %v317_v32, %v313_v30  ;;  %v316_v46 = vmul.u32 58254, %v311_v19  ;;  %v322_v47 = vsel %vm321_vm12, 1, %v1934_v39 }
 0x120   : > { %v262_v19 = vshrl.u32 %v257_v29, 16 }
 0x121   : > { %vm325_vm15 = vc.u32 %v323_v42, %v319_v41 }
 0x123   : > { %v432_v50 = vpop.f32.mrf.mxu2 }
 0x126   : > { %v406_v51 = vpop.f32.mrf.mxu0  ;;  %v482_v52 = vpop.f32.mrf.mxu1 }
 0x127   : > { %v2152_v53 = vadd.f32 %v482_v52, %v430_v45  ;;  %v538_v54 = vpop.f32.mrf.mxu3  ;;  %v264_v45 = vsel %vm263_vm11, 1, %v1934_v39 }
 0x128   : > { %v266_v52 = vadd.s32 %v264_v45, %v258_v43  ;;  %v297_v54 = vsel %vm296_vm13, 1, %v1934_v39 }
 0x12e   : > { %v523_v55 = vpop.f32.mrf.mxu2  ;;  %v469_v56 = vpop.f32.mrf.mxu0 }
 0x12f   : > { %v2154_v57 = vadd.f32 %v523_v55, %v457_v48  ;;  %v470_v58 = vadd.f32 %v469_v56, %v417_v44  ;;  %v484_v59 = vpop.f32.mrf.mxu1  ;;  %v293_v44 = vsel %vm292_vm10, 1, %v1934_v39  ;;  %v268_v55 = vsel %vm267_vm14, 1, %v1934_v39 }
 0x130   : > { %v295_v50 = vadd.s32 %v293_v44, %v287_v40  ;;  %v324_v56 = vadd.s32 %v322_v47, %v316_v46  ;;  %v326_v59 = vsel %vm325_vm15, 1, %v1934_v39 }
 0x131   : > { %v2156_v60 = vadd.f32 %v536_v49, %v470_v58 }
 0x132   : > { %v328_v8 = vadd.s32 %v326_v59, %v324_v56 }
 0x136   : > { %v525_v61 = vpop.f32.mrf.mxu2  ;;  %v471_v62 = vpop.f32.mrf.mxu0 }
 0x137   : > { %v2158_v63 = vpop.f32.mrf.mxu1  ;;  %v2160_v0 = vpop.f32.mrf.mxu3  ;;  %v289_v61 = vshrl.u32 %v285_v15, 16  ;;  %v299_v62 = vadd.s32 %v297_v54, %v295_v50 }
 0x138   : > { %v623_v47 = vadd.f32 %v2158_v63, %v2154_v57 }
 0x139   : > { %v300_v14 = vadd.s32 %v299_v62, %v289_v61  ;;  %v979_v62 = vpop.permute.xlu0 %978 }
 0x13e   : > { %v2164_v3 = vpop.f32.mrf.mxu2  ;;  %v2166_v4 = vpop.f32.mrf.mxu0 }
 0x13f   : > { %v595_v5 = vpop.f32.mrf.mxu1  ;;  %v621_v6 = vpop.f32.mrf.mxu3  ;;  %v624_v31 = vadd.f32 %v2164_v3, %v2156_v60  ;;  %v555_v41 = vadd.f32 %v2166_v4, %v2152_v53 }
 0x140   : > { %v270_v5 = vadd.s32 %v268_v55, %v266_v52  ;;  %v318_v6 = vshrl.u32 %v314_v20, 16 }
 0x142   : > { %v271_v21 = vadd.s32 %v270_v5, %v260_v1  ;;  %v329_v24 = vadd.s32 %v328_v8, %v318_v6 }
 0x144   : > { %v272_v30 = vadd.s32 %v271_v21, %v262_v19  ;;  %v330_v32 = vadd.s32 %v329_v24, %v320_v22 }
 0x146   : > { %v608_v10 = vpop.f32.mrf.mxu2  ;;  %v551_v11 = vpop.f32.mrf.mxu0  ;;  %v273_v34 = vshrl.u32 %v272_v30, 4  ;;  %v331_v20 = vshrl.u32 %v330_v32, 4 }
 0x147   : > { %v2176_v13 = vpop.f32.mrf.mxu1  ;;  %v291_v11 = vshrl.u32 %v286_v23, 16 }
 0x148   : > { %v274_v37 = vmul.u32 18, %v273_v34  ;;  %v332_v23 = vmul.u32 18, %v331_v20  ;;  %v694_v45 = vadd.f32 %v2176_v13, %v624_v31 }
 0x149   : > { %v2179_v17 = vpop.f32.mrf.mxu3  ;;  %v301_v26 = vadd.s32 %v300_v14, %v291_v11  ;;  %v1935_v11 = vmov 0.0  }
 0x14a   : > { %v275_v43 = vsub.s32 %v2162_v2, %v274_v37  ;;  %v333_v44 = vsub.s32 %v2174_v12, %v332_v23 }
 0x14c   : > { %vm336_vm10 = vcmp.ne.s32.totalorder %v275_v43, 0  ;;  %vm339_vm11 = vcmp.lt.s32.totalorder %v275_v43, 0  ;;  %vm338_vm12 = vcmp.ne.s32.totalorder %v333_v44, 0  ;;  %vm341_vm13 = vcmp.lt.s32.totalorder %v333_v44, 0 }
 0x14d   : > { %vm2213_vm15 = vmand %vm339_vm11, %vm336_vm10  ;;  %v347_v12 = vadd.s32 18, %v333_v44  ;;  %vm360_vm11 = vcmask 154624  }
 0x14e   : > { %v2184_v27 = vpop.f32.mrf.mxu2  ;;  %v2186_v28 = vpop.f32.mrf.mxu0  ;;  %vm344_vm9 = vmand %vm341_vm13, %vm338_vm12  ;;  %361 = vst.msk [vmem:[#allocation2] sm:$0xff] %vm360_vm11, %v1935_v11 }
 0x14f   : > { %v678_v33 = vpop.f32.mrf.mxu1  ;;  %v693_v60 = vadd.f32 %v2186_v28, %v623_v47  ;;  %v350_v56 = vsel %vm344_vm9, %v347_v12, %v333_v44  ;;  %vm988_vm9 = vcmask 261120  }
 0x150   : > { %v302_v33 = vshrl.u32 %v301_v26, 4  ;;  %vm353_vm10 = vcmp.lt.s32.totalorder %v350_v56, 16 }
 0x151   : > { %v735_v36 = vpop.f32.mrf.mxu3  ;;  %v2227_v19 = vsel %vm353_vm10, 1.0, %v1935_v11  ;;  %vm1046_vm10 = vcmask 416768  }
 0x152   : > { %v303_v36 = vmul.u32 18, %v302_v33 }
 0x154   : > { %v304_v29 = vsub.s32 %v2169_v7, %v303_v36  ;;  %v625_v7 = vadd.f32 %v2160_v0, %v555_v41  ;;  %v345_v0 = vadd.s32 18, %v275_v43 }
 0x156   : > { %v691_v48 = vpop.f32.mrf.mxu2  ;;  %v665_v49 = vpop.f32.mrf.mxu0  ;;  %vm337_vm0 = vcmp.ne.s32.totalorder %v304_v29, 0  ;;  %vm340_vm1 = vcmp.lt.s32.totalorder %v304_v29, 0  ;;  %v695_v53 = vadd.f32 %v2184_v27, %v625_v7  ;;  %v346_v3 = vadd.s32 18, %v304_v29 }
 0x157   : > { %v2191_v51 = vpop.f32.mrf.mxu1  ;;  %vm2209_vm14 = vmand %vm340_vm1, %vm337_vm0  ;;  %v763_v27 = vadd.f32 %v2179_v17, %v693_v60  ;;  %v348_v55 = vsel %vm2213_vm15, %v345_v0, %v275_v43  ;;  %vm362_vm15 = vcmask 703896  }
 0x158   : > { %v765_v13 = vadd.f32 %v2191_v51, %v695_v53  ;;  %v349_v54 = vsel %vm2209_vm14, %v346_v3, %v304_v29  ;;  %vm351_vm1 = vcmp.lt.s32.totalorder %v348_v55, 16  ;;  %363 = vst.msk [vmem:[#allocation2 + $0x10] sm:$0xff] %vm362_vm15, %v1935_v11 }
 0x159   : > { %v816_v58 = vpop.f32.mrf.mxu3  ;;  %vm352_vm0 = vcmp.lt.s32.totalorder %v349_v54, 16  ;;  %v2223_v14 = vsel %vm351_vm1, 1.0, %v1935_v11  ;;  %vm1073_vm1 = vcmask 1043456  }
 0x15e   : > { %v803_v9 = vpop.f32.mrf.mxu2  ;;  %v746_v10 = vpop.f32.mrf.mxu0 }
 0x15f   : > { %v761_v18 = vpop.f32.mrf.mxu1  ;;  %v764_v48 = vadd.f32 %v746_v10, %v694_v45  ;;  %v833_v59 = vadd.f32 %v803_v9, %v763_v27 }
 0x160   : > { %v2225_v18 = vsel %vm352_vm0, 1.0, %v1935_v11  ;;  %vm1043_vm0 = vcmask 1047704  }
 0x161   : > { %v818_v25 = vpop.f32.mrf.mxu3  ;;  %v834_v49 = vadd.f32 %v816_v58, %v764_v48 }
 0x166   : > { %v805_v39 = vpop.f32.mrf.mxu2  ;;  %v748_v15 = vpop.f32.mrf.mxu0 }
 0x167   : > { %v873_v16 = vpop.f32.mrf.mxu1 }
 0x168   : > { %v903_v1 = vadd.f32 %v873_v16, %v833_v59 }
 0x169   : > { %v899_v35 = vpop.f32.mrf.mxu3 }
 0x16e   : > { %v886_v38 = vpop.f32.mrf.mxu2  ;;  %v829_v40 = vpop.f32.mrf.mxu0 }
 0x16f   : > { %v875_v42 = vpop.f32.mrf.mxu1  ;;  %v904_v28 = vadd.f32 %v886_v38, %v834_v49  ;;  %v835_v52 = vadd.f32 %v829_v40, %v765_v13 }
 0x171   : > { %v901_v46 = vpop.f32.mrf.mxu3  ;;  %v905_v51 = vadd.f32 %v899_v35, %v835_v52 }
 0x176   : > { %v888_v4 = vpop.f32.mrf.mxu2  ;;  %v831_v57 = vpop.f32.mrf.mxu0 }
 0x177   : > { %v956_v50 = vpop.f32.mrf.mxu1 }
 0x178   : > { %v974_v61 = vadd.f32 %v956_v50, %v904_v28 }
 0x17a   : > { %v982_v17 = vadd.f32 %v979_v62, %v974_v61 }
 0x17c   : > { %v985_v24 = vmul.f32 %v2225_v18, %v982_v17 }
 0x17e   : > { %v969_v58 = vpop.f32.mrf.mxu2  ;;  %v943_v5 = vpop.f32.mrf.mxu0 }
 0x17f   : > { %v975_v6 = vadd.f32 %v969_v58, %v905_v51  ;;  %v973_v8 = vadd.f32 %v943_v5, %v903_v1  ;;  %v958_v10 = vpop.f32.mrf.mxu1 }
 0x180   : > { %v234_v10 = vld [vmem:[%s2414_s3] sm:$0xf] }
 0x181   : > { %v983_v9 = vadd.f32 %v979_v62, %v975_v6  ;;  %v981_v21 = vadd.f32 %v979_v62, %v973_v8 }
 0x183   : > { %v984_v22 = vmul.f32 %v2223_v14, %v981_v21  ;;  %v986_v25 = vmul.f32 %v2227_v19, %v983_v9 }
 0x185   : > { %v987_v26 = vadd.f32 %v985_v24, %v984_v22  ;;  %v989_v39 = vsel %vm988_vm9, %v986_v25, 0.0  ;;  %v235_v25 = vld [vmem:[%s2414_s3 + $0x4] sm:$0xf] }
 0x186   : > { %v971_v30 = vpop.f32.mrf.mxu2  ;;  %v945_v32 = vpop.f32.mrf.mxu0 }
 0x187   : > { %v990_v15 = vadd.f32 %v989_v39, %v987_v26 }
 0x189   : > { %991 = vadd.xlane.f32.xlu1 %v990_v15 }
 0x1fc   : > { %v992_v33 = vpop.xlane.xlu1 %991 }
 0x1fd   : > { %v993_v16 = vmul.f32 0.00390625, %v992_v33 }
 0x1ff   : > { %v994_v34 = vsub.f32 %v981_v21, %v993_v16  ;;  %v995_v20 = vsub.f32 %v982_v17, %v993_v16  ;;  %v996_v35 = vsub.f32 %v983_v9, %v993_v16 }
 0x201   : > { %v997_v36 = vmul.f32 %v994_v34, %v994_v34  ;;  %v998_v37 = vmul.f32 %v995_v20, %v995_v20  ;;  %v999_v23 = vmul.f32 %v996_v35, %v996_v35 }
 0x203   : > { %v1000_v38 = vmul.f32 %v2223_v14, %v997_v36  ;;  %v1001_v40 = vmul.f32 %v2225_v18, %v998_v37  ;;  %v1002_v29 = vmul.f32 %v2227_v19, %v999_v23 }
 0x205   : > { %v1003_v31 = vadd.f32 %v1001_v40, %v1000_v38  ;;  %v1004_v41 = vsel %vm988_vm9, %v1002_v29, 0.0 }
 0x207   : > { %v1005_v42 = vadd.f32 %v1004_v41, %v1003_v31 }
 0x209   : > { %1006 = vadd.xlane.f32.xlu2 %v1005_v42  ;;  %v236_v42 = vld [vmem:[%s2414_s3 + $0x8] sm:$0xf] }
 0x27c   : > { %v1007_v43 = vpop.xlane.xlu2 %1006 }
 0x27d   : > { %v1008_v44 = vmul.f32 0.00390625, %v1007_v43 }
 0x27f   : > { %v1009_v45 = vadd.f32 1e-05, %v1008_v44 }
 0x281   : > { %1858 = vrsqrt.f32 %v1009_v45  ;;  %vm1016_vm13 = vweird.f32 %v1009_v45 }
 0x287   : > { %v1859_v46 = vpop.eup %1858 }
 0x288   : > { %v1011_v47 = vmul.f32 %v1859_v46, %v1009_v45  ;;  %vm1017_vm12 = vweird.f32 %v1859_v46 }
 0x289   : > { %vm1018_vm14 = vmor %vm1016_vm13, %vm1017_vm12 }
 0x28a   : > { %v1012_v7 = vmul.f32 %v1859_v46, %v1011_v47 }
 0x28c   : > { %v1013_v48 = vmul.f32 0.5, %v1012_v7 }
 0x28e   : > { %v1014_v53 = vsub.f32 1.5, %v1013_v48 }
 0x290   : > { %v1015_v60 = vmul.f32 %v1859_v46, %v1014_v53 }
 0x292   : > { %v1019_v2 = vsel %vm1018_vm14, %v1859_v46, %v1015_v60 }
 0x293   : > { %v1020_v3 = vmul.f32 %v1019_v2, %v994_v34  ;;  %v1021_v63 = vmul.f32 %v1019_v2, %v995_v20  ;;  %v1022_v13 = vmul.f32 %v1019_v2, %v996_v35 }
 0x295   : > { %v1023_v4 = vmax.f32 %v1020_v3, 0.0  ;;  %v1024_v0 = vmax.f32 %v1021_v63, 0.0  ;;  %v1025_v49 = vmax.f32 %v1022_v13, 0.0 }
 0x297   : > { %v1026_v57 = vmul.f32 %v2223_v14, %v1023_v4  ;;  %v1027_v12 = vmul.f32 %v2225_v18, %v1024_v0  ;;  %v1028_v50 = vmul.f32 %v2227_v19, %v1025_v49 }
 0x299   : > { %1032 = vrot.lane.b32.xlu0 %v1026_v57, %s1936_s6 }
 0x2a1   : > { %1034 = vrot.lane.b32.xlu0 %v1027_v12, %s1936_s6  ;;  %v237_v12 = vld [vmem:[%s2414_s3 + $0xc] sm:$0xf] }
 0x2a9   : > { %1036 = vrot.lane.b32.xlu0 %v1028_v50, %s1936_s6 }
 0x30b   : > { %v1033_v27 = vpop.permute.xlu0 %1032 }
 0x30c   : > { %1044 = vst.msk [vmem:[#allocation2] sm:$0xff] %vm1043_vm0, %v1033_v27 }
 0x313   : > { %v1048_v28 = vld [vmem:[#allocation2] sm:$0xff]  ;;  %v1035_v52 = vpop.permute.xlu0 %1034 }
 0x314   : > { %v1038_v54 = vsel %vm360_vm11, %v1033_v27, %v1035_v52 }
 0x315   : > { %v1051_v55 = vpack.c.bf16 %v1038_v54, %v1048_v28  ;;  %v238_v54 = vld [vmem:[%s2414_s3 + $0x10] sm:$0xf] }
 0x317   : > { %v1055_v56 = vunpack.c.l.b16 %v1051_v55  ;;  %v1056_v59 = vunpack.c.h.b16 %v1051_v55 }
 0x319   : > { %v1058_v61 = vpack.c.b16 %v1055_v56, %v1055_v56  ;;  %v1059_v62 = vpack.c.b16 %v1056_v59, %v1056_v59 }
 0x31b   : > { %v1037_v1 = vpop.permute.xlu0 %1036  ;;  %1063 = vrot.lane.b32.xlu2 %v1059_v62, %s1926_s10  ;;  %1061 = vrot.lane.b32.xlu0 %v1058_v61, %s1926_s10  ;;  %v1126_v51 = vsel %vm1073_vm1, %v1058_v61, 0  ;;  %v1129_v24 = vsel %vm1073_vm1, %v1059_v62, 0 }
 0x31c   : > { %v1039_v58 = vsel %vm360_vm11, %v1035_v52, %v1037_v1  ;;  %1141 = vmatpush.bf16.msrb.mxu2 %v1126_v51  ;;  %vm1069_vm11 = vcmask 64512  }
 0x31d   : > { %1047 = vst.msk [vmem:[#allocation2 + $0x10] sm:$0xff] %vm1046_vm10, %v1039_v58 }
 0x31f   : > { %1776 = vmatmul.msk.bf16.vlgmr.msrb.gmra.mxu2 %vm1069_vm11, %v234_v10 }
 0x323   : > { %1235 = vrot.lane.b32.xlu2 %v1058_v61, %s1928_s12  ;;  %1173 = vrot.lane.b32.xlu0 %v1058_v61, %s1927_s11 }
 0x324   : > { %v1050_v5 = vld [vmem:[#allocation2 + $0x10] sm:$0xff] }
 0x325   : > { %v1052_v17 = vpack.c.bf16 %v1050_v5, %v1050_v5  ;;  %v239_v5 = vld [vmem:[%s2414_s3 + $0x14] sm:$0xf] }
 0x327   : > { %v1057_v6 = vunpack.c.l.b16 %v1052_v17 }
 0x329   : > { %v1060_v8 = vpack.c.b16 %v1057_v6, %v1057_v6 }
 0x32b   : > { %1065 = vrot.lane.b32.xlu1 %v1060_v8, %s1926_s10  ;;  %1297 = vrot.lane.b32.xlu2 %v1058_v61, %s1929_s13  ;;  %v1132_v20 = vsel %vm1073_vm1, %v1060_v8, 0 }
 0x32c   : > { %1175 = vrot.lane.b32.xlu0 %v1059_v62, %s1927_s11 }
 0x333   : > { %1237 = vrot.lane.b32.xlu1 %v1059_v62, %s1928_s12  ;;  %1359 = vrot.lane.b32.xlu2 %v1058_v61, %s1930_s14 }
 0x334   : > { %1177 = vrot.lane.b32.xlu0 %v1060_v8, %s1927_s11  ;;  %s1882_s11 = scalar_lea.hbm %s2416_s5, 48 }
 0x33b   : > { %1299 = vrot.lane.b32.xlu1 %v1059_v62, %s1929_s13  ;;  %1421 = vrot.lane.b32.xlu2 %v1058_v61, %s1931_s15 }
 0x33c   : > { %1239 = vrot.lane.b32.xlu0 %v1060_v8, %s1928_s12 }
 0x343   : > { %1361 = vrot.lane.b32.xlu1 %v1059_v62, %s1930_s14  ;;  %1483 = vrot.lane.b32.xlu2 %v1058_v61, %s1932_s16 }
 0x344   : > { %1301 = vrot.lane.b32.xlu0 %v1060_v8, %s1929_s13 }
 0x34b   : > { %1423 = vrot.lane.b32.xlu1 %v1059_v62, %s1931_s15  ;;  %1545 = vrot.lane.b32.xlu2 %v1058_v61, %s1933_s17 }
 0x34c   : > { %1363 = vrot.lane.b32.xlu0 %v1060_v8, %s1930_s14  ;;  %s215_s14 = sand.u32 1, %s1916_s19  }
 0x353   : > { %1485 = vrot.lane.b32.xlu1 %v1059_v62, %s1932_s16 }
 0x354   : > { %1425 = vrot.lane.b32.xlu0 %v1060_v8, %s1931_s15  ;;  %s1803_s15 = smul.u32 24, %s215_s14 }
 0x356   : > { %s217_s9 = scalar_lea.vmem [#allocation3], %s1803_s15 }
 0x357   : > { %s1676_s23 = sshll.u32 %s217_s9, 4  ;;  %s1677_s23 = int_to_ptr.vmem [resolvable:$true] %s1676_s23 }
 0x35b   : > { %1547 = vrot.lane.b32.xlu1 %v1059_v62, %s1933_s17 }
 0x35c   : > { %1487 = vrot.lane.b32.xlu0 %v1060_v8, %s1932_s16  ;;  %s1805_s16 = smul.u32 24, %s1988_s22  ;;  %s1663_s22 = scalar_lea.sflag [#allocation4], %s215_s14 }
 0x35e   : > { %s1674_s8 = scalar_lea.hbm %s2416_s5, %s1805_s16 }
 0x35f   : > { %s1678_s25 = sshll.u32 %s1674_s8, 4  ;;  %s1679_s25 = int_to_ptr.hbm [resolvable:$true] %s1678_s25 }
 0x360   : > { %s1876_s26 = sshra.s32 %s1679_s25, 4  ;;  %s1877_s26 = int_to_ptr.hbm [resolvable:$true] %s1876_s26 }
 0x361   : > { %s1878_s30 = scalar_lea.hbm %s1877_s26, 24  ;;  %p1883_p0 = scmp.lt.s32.totalorder %s1877_s26, %s2416_s5 }
 0x362   : > { %p1879_p11 = scmp.ne.s32.totalorder %s1877_s26, %s1878_s30  ;;  %p1884_p1 = scmp.lt.s32.totalorder %s1882_s11, %s1878_s30 }
 0x364   : > { %1549 = vrot.lane.b32.xlu0 %v1060_v8, %s1933_s17  ;;  %p1880_p12 = pnand %p1879_p11, %p2005_p5  ;;  %p1885_p2 = por %p1884_p1, %p1883_p0 }
 0x366   : > { %p1881_p13 = pneg %p1880_p12 }
 0x368   : > { %p1886_p3 = pnand %p1885_p2, %p1881_p13 }
 0x375   : > { %v1064_v11 = vpop.permute.xlu2 %1063 }
 0x37d   : > { %v1236_v32 = vpop.permute.xlu2 %1235 }
 0x385   : > { %v1298_v31 = vpop.permute.xlu2 %1297 }
 0x38d   : > { %v1062_v9 = vpop.permute.xlu0 %1061  ;;  %v1360_v53 = vpop.permute.xlu2 %1359 }
 0x38e   : > { %v1067_v21 = vsel %vm378_vm2, %v1062_v9, %v1064_v11 }
 0x38f   : > { %v1075_v22 = vsel %vm1073_vm1, %v1067_v21, 0 }
 0x390   : > { %1090 = vmatpush.bf16.msra.mxu3 %v1075_v22 }
 0x393   : > { %1773 = vmatmul.msk.bf16.vlgmr.msra.gmra.mxu3 %vm1069_vm11, %v235_v25 }
 0x394   : > { %1154 = vmatpush.bf16.msrb.mxu3 %v1129_v24 }
 0x395   : > { %v1174_v26 = vpop.permute.xlu0 %1173  ;;  %v1422_v13 = vpop.permute.xlu2 %1421 }
 0x39d   : > { %v1066_v30 = vpop.permute.xlu1 %1065  ;;  %v1484_v61 = vpop.permute.xlu2 %1483 }
 0x39e   : > { %v1068_v39 = vsel %vm378_vm2, %v1064_v11, %v1066_v30  ;;  %v1081_v15 = vsel %vm1073_vm1, %v1066_v30, 0  ;;  %v1176_v33 = vpop.permute.xlu0 %1175  ;;  %vm2424_vm2 = vcmask 736256  }
 0x39f   : > { %v1078_v16 = vsel %vm1073_vm1, %v1068_v39, 0  ;;  %1116 = vmatpush.bf16.msrb.mxu1 %v1081_v15  ;;  %v1179_v34 = vsel %vm499_vm3, %v1174_v26, %v1176_v33  ;;  %v240_v26 = vld [vmem:[%s2414_s3 + $0x18] sm:$0xf] }
 0x3a0   : > { %1103 = vmatpush.bf16.msrb.mxu0 %v1078_v16  ;;  %v1185_v35 = vsel %vm1073_vm1, %v1179_v34, 0  ;;  %v242_v16 = vld [vmem:[%s2414_s3 + $0x20] sm:$0xf] }
 0x3a1   : > { %v244_v34 = vld [vmem:[%s2415_s4] sm:$0xff] }
 0x3a2   : > { %1775 = vmatmul.msk.bf16.vlgmr.msrb.gmra.mxu1 %vm1069_vm11, %v235_v25  ;;  %1609 = vperm.xlu2 %1857, %v244_v34  }
 0x3a3   : > { %1200 = vmatpush.bf16.msra.mxu1 %v1185_v35  ;;  %1774 = vmatmul.msk.bf16.vlgmr.msrb.gmra.mxu0 %vm1069_vm11, %v235_v25 }
 0x3a4   : > { %1167 = vmatpush.bf16.msra.mxu0 %v1132_v20  ;;  %1777 = vmatmul.msk.bf16.vlgmr.msrb.gmra.mxu3 %vm1069_vm11, %v234_v10  ;;  %v1143_v20 = vpop.f32.mrf.mxu2 }
 0x3a5   : > { %v1238_v36 = vpop.permute.xlu1 %1237  ;;  %v1546_v11 = vpop.permute.xlu2 %1545 }
 0x3a6   : > { %v1241_v37 = vsel %vm569_vm4, %v1236_v32, %v1238_v36  ;;  %v1178_v23 = vpop.permute.xlu0 %1177 }
 0x3a7   : > { %v1247_v38 = vsel %vm1073_vm1, %v1241_v37, 0  ;;  %v1180_v40 = vsel %vm499_vm3, %v1176_v33, %v1178_v23  ;;  %v1191_v29 = vsel %vm1073_vm1, %v1178_v23, 0  ;;  %vm2425_vm3 = vmmov %vm2424_vm2  ;;  %v241_v33 = vld [vmem:[%s2414_s3 + $0x1c] sm:$0xf] }
 0x3a8   : > { %1262 = vmatpush.bf16.msrb.mxu0 %v1247_v38  ;;  %v1188_v41 = vsel %vm1073_vm1, %v1180_v40, 0  ;;  %1226 = vmatpush.bf16.msra.mxu3 %v1191_v29 }
 0x3a9   : > { %1213 = vmatpush.bf16.msra.mxu2 %v1188_v41 }
 0x3ac   : > { %1780 = vmatmul.msk.bf16.vlgmr.msra.gmra.mxu2 %vm1069_vm11, %v236_v42  ;;  %v1145_v35 = vpop.f32.mrf.mxu2 }
 0x3ad   : > { %v1300_v43 = vpop.permute.xlu1 %1299 }
 0x3ae   : > { %v1303_v44 = vsel %vm639_vm5, %v1298_v31, %v1300_v43  ;;  %v1240_v45 = vpop.permute.xlu0 %1239 }
 0x3af   : > { %v1309_v46 = vsel %vm1073_vm1, %v1303_v44, 0  ;;  %v1242_v47 = vsel %vm569_vm4, %v1238_v36, %v1240_v45  ;;  %v1253_v7 = vsel %vm1073_vm1, %v1240_v45, 0 }
 0x3b0   : > { %1324 = vmatpush.bf16.msrb.mxu3 %v1309_v46  ;;  %v1250_v48 = vsel %vm1073_vm1, %v1242_v47, 0  ;;  %1288 = vmatpush.bf16.msrb.mxu2 %v1253_v7 }
 0x3b1   : > { %1275 = vmatpush.bf16.msrb.mxu1 %v1250_v48 }
 0x3b2   : > { %1779 = vmatmul.msk.bf16.vlgmr.msra.gmra.mxu1 %vm1069_vm11, %v236_v42 }
 0x3b3   : > { %1778 = vmatmul.msk.bf16.vlgmr.msra.gmra.mxu0 %vm1069_vm11, %v234_v10 }
 0x3b4   : > { %1781 = vmatmul.msk.bf16.vlgmr.msra.gmra.mxu3 %vm1069_vm11, %v236_v42 }
 0x3b5   : > { %v1362_v60 = vpop.permute.xlu1 %1361 }
 0x3b6   : > { %v1365_v2 = vsel %vm709_vm6, %v1360_v53, %v1362_v60  ;;  %v1302_v3 = vpop.permute.xlu0 %1301 }
 0x3b7   : > { %v1371_v4 = vsel %vm1073_vm1, %v1365_v2, 0  ;;  %v1304_v57 = vsel %vm639_vm5, %v1300_v43, %v1302_v3  ;;  %v1315_v63 = vsel %vm1073_vm1, %v1302_v3, 0 }
 0x3b8   : > { %1386 = vmatpush.bf16.msra.mxu2 %v1371_v4  ;;  %v1312_v0 = vsel %vm1073_vm1, %v1304_v57, 0  ;;  %1350 = vmatpush.bf16.msra.mxu1 %v1315_v63 }
 0x3b9   : > { %1337 = vmatpush.bf16.msra.mxu0 %v1312_v0 }
 0x3bc   : > { %1784 = vmatmul.msk.bf16.vlgmr.msrb.gmra.mxu2 %vm1069_vm11, %v237_v12 }
 0x3bd   : > { %v1424_v49 = vpop.permute.xlu1 %1423 }
 0x3be   : > { %v1364_v50 = vpop.permute.xlu0 %1363  ;;  %v1427_v27 = vsel %vm779_vm7, %v1422_v13, %v1424_v49 }
 0x3bf   : > { %v1366_v28 = vsel %vm709_vm6, %v1362_v60, %v1364_v50  ;;  %v1433_v55 = vsel %vm1073_vm1, %v1427_v27, 0  ;;  %v1377_v56 = vsel %vm1073_vm1, %v1364_v50, 0 }
 0x3c0   : > { %v1374_v52 = vsel %vm1073_vm1, %v1366_v28, 0 }
 0x3c1   : > { %1399 = vmatpush.bf16.msra.mxu3 %v1374_v52 }
 0x3c2   : > { %1783 = vmatmul.msk.bf16.vlgmr.msrb.gmra.mxu1 %vm1069_vm11, %v237_v12 }
 0x3c3   : > { %1448 = vmatpush.bf16.msrb.mxu1 %v1433_v55  ;;  %1782 = vmatmul.msk.bf16.vlgmr.msrb.gmra.mxu0 %vm1069_vm11, %v237_v12 }
 0x3c4   : > { %1412 = vmatpush.bf16.msrb.mxu0 %v1377_v56  ;;  %1785 = vmatmul.msk.bf16.vlgmr.msrb.gmra.mxu3 %vm1069_vm11, %v238_v54 }
 0x3c5   : > { %v1486_v59 = vpop.permute.xlu1 %1485 }
 0x3c6   : > { %v1426_v62 = vpop.permute.xlu0 %1425  ;;  %v1489_v9 = vsel %vm849_vm8, %v1484_v61, %v1486_v59 }
 0x3c7   : > { %v1428_v1 = vsel %vm779_vm7, %v1424_v49, %v1426_v62  ;;  %v1439_v51 = vsel %vm1073_vm1, %v1426_v62, 0  ;;  %v1495_v24 = vsel %vm1073_vm1, %v1489_v9, 0 }
 0x3c8   : > { %v1436_v58 = vsel %vm1073_vm1, %v1428_v1, 0  ;;  %1474 = vmatpush.bf16.msrb.mxu3 %v1439_v51 }
 0x3c9   : > { %1461 = vmatpush.bf16.msrb.mxu2 %v1436_v58 }
 0x3cc   : > { %1788 = vmatmul.msk.bf16.vlgmr.msra.gmra.mxu2 %vm1069_vm11, %v239_v5 }
 0x3cd   : > { %v1548_v17 = vpop.permute.xlu1 %1547 }
 0x3ce   : > { %v1488_v6 = vpop.permute.xlu0 %1487  ;;  %v1551_v21 = vsel %vm2424_vm2, %v1546_v11, %v1548_v17 }
 0x3cf   : > { %v1490_v8 = vsel %vm849_vm8, %v1486_v59, %v1488_v6  ;;  %v1501_v10 = vsel %vm1073_vm1, %v1488_v6, 0  ;;  %v1557_v25 = vsel %vm1073_vm1, %v1551_v21, 0 }
 0x3d0   : > { %1536 = vmatpush.bf16.msra.mxu2 %v1501_v10  ;;  %v1498_v22 = vsel %vm1073_vm1, %v1490_v8, 0 }
 0x3d2   : > { %1787 = vmatmul.msk.bf16.vlgmr.msra.gmra.mxu1 %vm1069_vm11, %v238_v54 }
 0x3d3   : > { %1786 = vmatmul.msk.bf16.vlgmr.msra.gmra.mxu0 %vm1069_vm11, %v238_v54  ;;  %1523 = vmatpush.bf16.msra.mxu1 %v1498_v22 }
 0x3d4   : > { %1510 = vmatpush.bf16.msra.mxu0 %v1495_v24  ;;  %1789 = vmatmul.msk.bf16.vlgmr.msra.gmra.mxu3 %vm1069_vm11, %v239_v5 }
 0x3d5   : > { %1572 = vmatpush.bf16.msra.mxu3 %v1557_v25 }
 0x3d6   : > { %v1550_v30 = vpop.permute.xlu0 %1549 }
 0x3d7   : > { %v1552_v32 = vsel %vm2425_vm3, %v1548_v17, %v1550_v30  ;;  %v1563_v39 = vsel %vm1073_vm1, %v1550_v30, 0 }
 0x3d8   : > { %v1560_v15 = vsel %vm1073_vm1, %v1552_v32, 0 }
 0x3dc   : > { %1792 = vmatmul.msk.bf16.vlgmr.msrb.gmra.mxu2 %vm1069_vm11, %v240_v26 }
 0x3e2   : > { %1791 = vmatmul.msk.bf16.vlgmr.msrb.gmra.mxu1 %vm1069_vm11, %v240_v26 }
 0x3e3   : > { %1598 = vmatpush.bf16.msrb.mxu1 %v1563_v39  ;;  %1790 = vmatmul.msk.bf16.vlgmr.msrb.gmra.mxu0 %vm1069_vm11, %v239_v5 }
 0x3e4   : > { %1585 = vmatpush.bf16.msrb.mxu0 %v1560_v15  ;;  %1793 = vmatmul.msk.bf16.vlgmr.msrb.gmra.mxu3 %vm1069_vm11, %v240_v26 }
 0x3ec   : > { %1796 = vmatmul.msk.bf16.vlgmr.msra.gmra.mxu2 %vm1069_vm11, %v241_v33 }
 0x3f2   : > { %1795 = vmatmul.msk.bf16.vlgmr.msra.gmra.mxu1 %vm1069_vm11, %v241_v33 }
 0x3f3   : > { %1794 = vmatmul.msk.bf16.vlgmr.msra.gmra.mxu0 %vm1069_vm11, %v241_v33 }
 0x3f4   : > { %1797 = vmatmul.msk.bf16.vlgmr.msra.gmra.mxu3 %vm1069_vm11, %v242_v16 }
 0x402   : > { %1799 = vmatmul.msk.bf16.vlgmr.msrb.gmra.mxu1 %vm1069_vm11, %v242_v16 }
 0x403   : > { %1798 = vmatmul.msk.bf16.vlgmr.msrb.gmra.mxu0 %vm1069_vm11, %v242_v16 }
 0x416   : > { %v1092_v36 = vpop.f32.mrf.mxu3 }
 0x417   : > { %v1144_v37 = vadd.f32 %v1143_v20, %v1092_v36 }
 0x41e   : > { %v1094_v23 = vpop.f32.mrf.mxu3 }
 0x41f   : > { %v1118_v38 = vpop.f32.mrf.mxu1 }
 0x420   : > { %v1105_v40 = vpop.f32.mrf.mxu0 }
 0x427   : > { %v1156_v29 = vpop.f32.mrf.mxu3  ;;  %v1120_v31 = vpop.f32.mrf.mxu1 }
 0x428   : > { %v1157_v41 = vadd.f32 %v1156_v29, %v1105_v40  ;;  %v1107_v42 = vpop.f32.mrf.mxu0 }
 0x42f   : > { %v1158_v43 = vpop.f32.mrf.mxu3  ;;  %v1202_v44 = vpop.f32.mrf.mxu1 }
 0x430   : > { %v1215_v45 = vpop.f32.mrf.mxu2  ;;  %v1232_v46 = vadd.f32 %v1202_v44, %v1144_v37  ;;  %v1169_v47 = vpop.f32.mrf.mxu0 }
 0x431   : > { %v1233_v7 = vadd.f32 %v1215_v45, %v1157_v41  ;;  %v1170_v48 = vadd.f32 %v1169_v47, %v1118_v38  ;;  %v1610_v41 = vpop.permute.xlu2 %1609 }
 0x437   : > { %v1228_v53 = vpop.f32.mrf.mxu3  ;;  %v1204_v60 = vpop.f32.mrf.mxu1 }
 0x438   : > { %v1217_v2 = vpop.f32.mrf.mxu2  ;;  %v1171_v3 = vpop.f32.mrf.mxu0  ;;  %v1234_v24 = vadd.f32 %v1228_v53, %v1170_v48 }
 0x43f   : > { %v1230_v4 = vpop.f32.mrf.mxu3  ;;  %v1277_v57 = vpop.f32.mrf.mxu1 }
 0x440   : > { %v1290_v63 = vpop.f32.mrf.mxu2  ;;  %v1264_v0 = vpop.f32.mrf.mxu0  ;;  %v1295_v30 = vadd.f32 %v1277_v57, %v1233_v7 }
 0x441   : > { %v1294_v22 = vadd.f32 %v1264_v0, %v1232_v46  ;;  %v1296_v26 = vadd.f32 %v1290_v63, %v1234_v24 }
 0x447   : > { %v1279_v12 = vpop.f32.mrf.mxu1  ;;  %v1326_v50 = vpop.f32.mrf.mxu3 }
 0x448   : > { %v1292_v13 = vpop.f32.mrf.mxu2  ;;  %v1266_v49 = vpop.f32.mrf.mxu0  ;;  %v1356_v25 = vadd.f32 %v1326_v50, %v1294_v22 }
 0x44f   : > { %v1352_v27 = vpop.f32.mrf.mxu1  ;;  %v1328_v54 = vpop.f32.mrf.mxu3 }
 0x450   : > { %v1388_v28 = vpop.f32.mrf.mxu2  ;;  %v1339_v52 = vpop.f32.mrf.mxu0  ;;  %v1358_v33 = vadd.f32 %v1352_v27, %v1296_v26 }
 0x451   : > { %v1418_v32 = vadd.f32 %v1388_v28, %v1356_v25  ;;  %v1357_v20 = vadd.f32 %v1339_v52, %v1295_v30 }
 0x457   : > { %v1354_v55 = vpop.f32.mrf.mxu1  ;;  %v1401_v61 = vpop.f32.mrf.mxu3 }
 0x458   : > { %v1390_v56 = vpop.f32.mrf.mxu2  ;;  %v1341_v59 = vpop.f32.mrf.mxu0  ;;  %v1419_v37 = vadd.f32 %v1401_v61, %v1357_v20 }
 0x45f   : > { %v1450_v62 = vpop.f32.mrf.mxu1  ;;  %v1403_v58 = vpop.f32.mrf.mxu3 }
 0x460   : > { %v1463_v1 = vpop.f32.mrf.mxu2  ;;  %v1414_v51 = vpop.f32.mrf.mxu0  ;;  %v1480_v35 = vadd.f32 %v1450_v62, %v1418_v32 }
 0x461   : > { %v1420_v36 = vadd.f32 %v1414_v51, %v1358_v33  ;;  %v1481_v40 = vadd.f32 %v1463_v1, %v1419_v37 }
 0x467   : > { %v1452_v5 = vpop.f32.mrf.mxu1  ;;  %v1476_v8 = vpop.f32.mrf.mxu3 }
 0x468   : > { %v1465_v17 = vpop.f32.mrf.mxu2  ;;  %v1416_v6 = vpop.f32.mrf.mxu0  ;;  %v1482_v38 = vadd.f32 %v1476_v8, %v1420_v36 }
 0x46f   : > { %v1525_v10 = vpop.f32.mrf.mxu1  ;;  %v1478_v21 = vpop.f32.mrf.mxu3 }
 0x470   : > { %v1538_v11 = vpop.f32.mrf.mxu2  ;;  %v1512_v9 = vpop.f32.mrf.mxu0  ;;  %v1543_v42 = vadd.f32 %v1525_v10, %v1481_v40 }
 0x471   : > { %v1542_v23 = vadd.f32 %v1512_v9, %v1480_v35  ;;  %v1544_v31 = vadd.f32 %v1538_v11, %v1482_v38 }
 0x477   : > { %v1527_v39 = vpop.f32.mrf.mxu1  ;;  %v1574_v34 = vpop.f32.mrf.mxu3 }
 0x478   : > { %v1540_v15 = vpop.f32.mrf.mxu2  ;;  %v1514_v16 = vpop.f32.mrf.mxu0  ;;  %v1604_v29 = vadd.f32 %v1574_v34, %v1542_v23 }
 0x47a   : > { %v1612_v47 = vadd.f32 %v1610_v41, %v1604_v29 }
 0x47c   : > { %v1615_v2 = vmul.f32 %v2223_v14, %v1612_v47 }
 0x47f   : > { %v1600_v43 = vpop.f32.mrf.mxu1  ;;  %v1576_v46 = vpop.f32.mrf.mxu3 }
 0x480   : > { %v1606_v44 = vadd.f32 %v1600_v43, %v1544_v31  ;;  %v1587_v45 = vpop.f32.mrf.mxu0 }
 0x481   : > { %v1605_v7 = vadd.f32 %v1587_v45, %v1543_v42 }
 0x482   : > { %v1614_v48 = vadd.f32 %v1610_v41, %v1606_v44 }
 0x483   : > { %v1613_v53 = vadd.f32 %v1610_v41, %v1605_v7 }
 0x484   : > { %v1617_v60 = vmul.f32 %v2227_v19, %v1614_v48 }
 0x485   : > { %v1616_v3 = vmul.f32 %v2225_v18, %v1613_v53 }
 0x486   : > { %v1619_v63 = vsel %vm988_vm9, %v1617_v60, 0.0 }
 0x487   : > { %v1618_v4 = vadd.f32 %v1616_v3, %v1615_v2  ;;  %v1602_v57 = vpop.f32.mrf.mxu1 }
 0x488   : > { %v1589_v0 = vpop.f32.mrf.mxu0 }
 0x489   : > { %v1620_v12 = vadd.f32 %v1619_v63, %v1618_v4 }
 0x48b   : > { %1621 = vadd.xlane.f32.xlu1 %v1620_v12 }
 0x4fe   : > { %v1622_v13 = vpop.xlane.xlu1 %1621 }
 0x4ff   : > { %v1623_v49 = vmul.f32 0.00390625, %v1622_v13 }
 0x501   : > { %v1624_v50 = vsub.f32 %v1612_v47, %v1623_v49  ;;  %v1625_v27 = vsub.f32 %v1613_v53, %v1623_v49  ;;  %v1626_v28 = vsub.f32 %v1614_v48, %v1623_v49 }
 0x503   : > { %v1627_v52 = vmul.f32 %v1624_v50, %v1624_v50  ;;  %v1628_v54 = vmul.f32 %v1625_v27, %v1625_v27  ;;  %v1629_v55 = vmul.f32 %v1626_v28, %v1626_v28 }
 0x505   : > { %v1630_v56 = vmul.f32 %v2223_v14, %v1627_v52  ;;  %v1631_v59 = vmul.f32 %v2225_v18, %v1628_v54  ;;  %v1632_v61 = vmul.f32 %v2227_v19, %v1629_v55 }
 0x507   : > { %v1633_v62 = vadd.f32 %v1631_v59, %v1630_v56  ;;  %v1634_v1 = vsel %vm988_vm9, %v1632_v61, 0.0 }
 0x509   : > { %v1635_v51 = vadd.f32 %v1634_v1, %v1633_v62 }
 0x50b   : > { %1636 = vadd.xlane.f32.xlu0 %v1635_v51 }
 0x57e   : > { %v1637_v58 = vpop.xlane.xlu0 %1636 }
 0x57f   : > { %v1638_v5 = vmul.f32 0.00390625, %v1637_v58 }
 0x581   : > { %v1639_v17 = vadd.f32 1e-05, %v1638_v5 }
 0x583   : > { %1860 = vrsqrt.f32 %v1639_v17  ;;  %vm1646_vm5 = vweird.f32 %v1639_v17 }
 0x589   : > { %v1861_v6 = vpop.eup %1860 }
 0x58a   : > { %v1641_v8 = vmul.f32 %v1861_v6, %v1639_v17  ;;  %vm1647_vm4 = vweird.f32 %v1861_v6 }
 0x58b   : > { %vm1648_vm6 = vmor %vm1646_vm5, %vm1647_vm4 }
 0x58c   : > { %v1642_v10 = vmul.f32 %v1861_v6, %v1641_v8 }
 0x58e   : > { %v1643_v11 = vmul.f32 0.5, %v1642_v10 }
 0x590   : > { %v1644_v9 = vsub.f32 1.5, %v1643_v11 }
 0x592   : > { %v1645_v21 = vmul.f32 %v1861_v6, %v1644_v9 }
 0x594   : > { %v1649_v22 = vsel %vm1648_vm6, %v1861_v6, %v1645_v21 }
 0x595   : > { %v1650_v24 = vmul.f32 %v1649_v22, %v1624_v50  ;;  %v1651_v25 = vmul.f32 %v1649_v22, %v1625_v27  ;;  %v1652_v26 = vmul.f32 %v1649_v22, %v1626_v28 }
 0x597   : > { %v1653_v30 = vmax.f32 %v1650_v24, 0.0  ;;  %v1654_v32 = vmax.f32 %v1651_v25, 0.0  ;;  %v1655_v39 = vmax.f32 %v1652_v26, 0.0 }
 0x599   : > { %v1658_v15 = vmul.f32 %v2227_v19, %v1655_v39  ;;  %v1656_v33 = vmul.f32 %v2223_v14, %v1653_v30  ;;  %v1657_v16 = vmul.f32 %v2225_v18, %v1654_v32 }
 0x59b   : > { %1659 = vst [vmem:[%s217_s9] sm:$0xff] %v1656_v33 }
 0x59c   : > { %1660 = vst [vmem:[%s217_s9 + $0x8] sm:$0xff] %v1657_v16 }
 0x59d   : > { %1661 = vst.msk [vmem:[%s217_s9 + $0x10] sm:$0xff] %vm988_vm9, %v1658_v15 }
 0x59e   : > { %1889 = shalt.err (!%p1886_p3)
}
 0x59f   : > { %1806 = dma.vmem_to_hbm [thread:$0]  (%p2005_p5), %s1677_s23, 384, %s1679_s25, %s1663_s22  }
 0x5a0 PF: > { %p1812_p4 = scmp.ge.s32.totalorder %s1924_s21, 2  ;;  %s1690_s14 = sand.u32 1, %s1912_s18  }
 0x5a1   : > { %s1691_s15 = scalar_lea.sflag [#allocation4], %s1690_s14 }
 0x5a2   : > { %p1809_p7 = pnand %p1812_p4, %p2009_p6 }
 0x5a4   : > { %p1810_p8 = pneg %p1809_p7 }
 0x5a6   : > { %1907 = dma.done.wait (%p1810_p8), %s1691_s15, 384  }
 0x5a7   : > { %1909 = vsyncadd (%p1810_p8), %s1691_s15, 4294966912  ;;  %p15_p9 = scmp.ge.s32.totalorder %s1992_s24, 4   ;;  %s2426_s18 = smov %s1916_s19 }
 0x5a8   : > { %s2427_s19 = smov %s1920_s20  ;;  %s2428_s20 = smov %s2003_s27 }
 0x5a9   : > { %s2429_s21 = smov %s1992_s24  ;;  %17 = sbr.rel (!%p15_p9) target bundleno = 3 (0x3), region = 75 }
 0x5ae   :  { %1697 = vsyncpa [#allocation4], 1 }
 0x5af   :  { %1699 = vsyncpa [#allocation4 + $0x1], 1 }

</bundles_post_ra>
